<compile_context>
chip_gen: v7x
topology: tpu7x:2x2x1
jax: 0.10.0
libtpu: 0.0.40
codegen_flags: <defaults>
</compile_context>

<pallas_src>
import numpy as np
import jax
import jax.numpy as jnp
from jax.experimental import pallas as pl
from jax.experimental.pallas import tpu as pltpu

_EPS = 1e-5


def _make_kernel(N, H, W, Cpad, L, halo, Mpad):
    Hp, Wp = H + 2, W + 2
    cnt = float(N * H * W)                 # BN reduction count (interior only)
    # lane offsets of the 9 conv taps in the flat (row-major) padded layout,
    # tap-major order (dh, dw) matching the weight layout built in the wrapper
    shifts = [(dh - 1) * Wp + (dw - 1) for dh in range(3) for dw in range(3)]

    def conv3x3(src_ref, w_ref):
        """src_ref: (Cpad, L) zero-haloed flat activation; w_ref: (9, Cpad, Cpad).

        9 accumulating MXU dots (K=Cpad) on lane-shifted views -> (Cpad, Mpad)
        f32.  Results at non-interior lanes are garbage and are masked /
        discarded by the caller.  halo=128 makes the d==0 view lane-aligned;
        all slice starts are static."""
        acc = None
        for i, d in enumerate(shifts):
            tap = src_ref[:, halo + d:halo + d + Mpad]          # (Cpad, Mpad)
            part = jnp.dot(w_ref[i], tap,
                           preferred_element_type=jnp.float32)
            acc = part if acc is None else acc + part
        return acc

    def bn(z, g_ref, b_ref, mask):
        """Training-mode BatchNorm2d; two-pass (mean-centered) masked stats."""
        zm = z * mask
        mean = jnp.sum(zm, axis=1, keepdims=True) * (1.0 / cnt)   # (Cpad, 1)
        dev = (z - mean) * mask
        var = jnp.sum(dev * dev, axis=1, keepdims=True) * (1.0 / cnt)
        scale = g_ref[...] * jax.lax.rsqrt(var + _EPS)            # (Cpad, 1)
        return (z - mean) * scale + b_ref[...]

    def kernel(x_ref, m_ref, w1_ref, g1_ref, b1_ref, w2_ref, g2_ref, b2_ref,
               o_ref, ybuf_ref):
        mask = m_ref[...]                                # (1, Mpad), 1.=interior

        # conv1 -> bn1 -> relu; interior-mask so conv2 sees 'same' zero padding
        c1 = conv3x3(x_ref, w1_ref)                      # (Cpad, Mpad)
        y = jnp.maximum(bn(c1, g1_ref, b1_ref, mask), 0.0) * mask

        # stash y in the zero-haloed flat layout (VMEM scratch, no HBM trip).
        # Only the two halo strips need zeroing: interior pad positions are
        # already zero via the mask multiply above.  All stores lane-aligned.
        ybuf_ref[:, :halo] = jnp.zeros((Cpad, halo), jnp.float32)
        ybuf_ref[:, halo + Mpad:] = jnp.zeros((Cpad, L - halo - Mpad),
                                              jnp.float32)
        ybuf_ref[:, halo:halo + Mpad] = y

        # conv2 -> bn2 -> + residual -> relu (no trailing mask: wrapper slices
        # out the interior, so garbage at pad lanes is never observed)
        c2 = conv3x3(ybuf_ref, w2_ref)
        z = bn(c2, g2_ref, b2_ref, mask)
        res = x_ref[:, halo:halo + Mpad]                 # padded x (0 borders)
        o_ref[...] = jnp.maximum(z + res, 0.0)           # lane-dense store

    return kernel


def residual_block_forward(x_nchw, params):
    """Forward pass of ResidualBlock. Input/output are NCHW (PyTorch conv.)

    params = (w1, g1, b1, w2, g2, b2); conv weights in HWIO (3, 3, Cin, Cout).
    """
    w1, g1, b1, w2, g2, b2 = params
    N, C, H, W = x_nchw.shape
    Hp, Wp = H + 2, W + 2
    Mp = N * Hp * Wp                       # flattened padded-spatial length
    Mpad = ((Mp + 127) // 128) * 128       # lane-dense compute width
    Cpad = ((C + 7) // 8) * 8              # f32 sublane-aligned channel count
    halo = 128                             # lane-aligned halo (>= Wp + 1)
    assert halo >= Wp + 1, "halo must cover the max conv tap shift"
    # flat buffer: [halo zeros][Mp padded data][zeros], total lane-rounded
    L = ((halo + Mpad + halo + 127) // 128) * 128

    # ---- wrapper-side layout glue (tiny, one pass over the input) ----
    # channel-major (padded to Cpad), spatially zero-padded, flattened,
    # zero-haloed: (Cpad, L)
    xcf = jnp.transpose(x_nchw.astype(jnp.float32), (1, 0, 2, 3))  # (C,N,H,W)
    xp = jnp.pad(xcf, ((0, Cpad - C), (0, 0), (1, 1), (1, 1)))     # (Cpad,N,Hp,Wp)
    xf = jnp.pad(xp.reshape(Cpad, Mp), ((0, 0), (halo, L - Mp - halo)))

    # conv weights HWIO -> (9, Cout_pad, Cin_pad), tap-major (dh, dw)
    def prep_w(w):
        wt = jnp.transpose(w.astype(jnp.float32), (0, 1, 3, 2)).reshape(9, C, C)
        return jnp.pad(wt, ((0, 0), (0, Cpad - C), (0, Cpad - C)))

    def prep_v(v):
        return jnp.pad(v.astype(jnp.float32), (0, Cpad - C)).reshape(Cpad, 1)

    w1m, w2m = prep_w(w1), prep_w(w2)

    # interior mask over the flattened padded-spatial axis (static constant)
    m = np.zeros((N, Hp, Wp), np.float32)
    m[:, 1:H + 1, 1:W + 1] = 1.0
    mask = jnp.asarray(np.pad(m.reshape(1, Mp), ((0, 0), (0, Mpad - Mp))))

    kernel = _make_kernel(N, H, W, Cpad, L, halo, Mpad)
    vmem = pl.BlockSpec(memory_space=pltpu.MemorySpace.VMEM)

    flops = 2 * (9 * 2 * Cpad * Cpad * Mpad) + 16 * Cpad * Mpad
    bytes_accessed = 4 * (Cpad * L + Mpad + 2 * 9 * Cpad * Cpad
                          + 8 * Cpad + Cpad * Mpad)
    out_flat = pl.pallas_call(
        kernel,
        out_shape=jax.ShapeDtypeStruct((Cpad, Mpad), jnp.float32),
        in_specs=[vmem] * 8,
        out_specs=vmem,
        scratch_shapes=[
            pltpu.VMEM((Cpad, L), jnp.float32),   # y in haloed flat layout
        ],
        cost_estimate=pl.CostEstimate(flops=flops, transcendentals=2 * Cpad,
                                      bytes_accessed=bytes_accessed),
    )(xf, mask, w1m, prep_v(g1), prep_v(b1), w2m, prep_v(g2), prep_v(b2))

    # back to NCHW, dropping channel padding and pad positions
    out = out_flat[:C, :Mp].reshape(C, N, Hp, Wp)[:, :, 1:H + 1, 1:W + 1]
    return jnp.transpose(out, (1, 0, 2, 3))


def _ref_forward(x_nchw, params):
    """Pure-JAX reference (same math) for self-validation."""
    w1, g1, b1, w2, g2, b2 = params
    x = jnp.transpose(x_nchw, (0, 2, 3, 1)).astype(jnp.float32)

    def conv(a, w):
        return jax.lax.conv_general_dilated(
            a, w, window_strides=(1, 1), padding="SAME",
            dimension_numbers=("NHWC", "HWIO", "NHWC"))

    def bn(y, g, b):
        mu = jnp.mean(y, axis=(0, 1, 2), keepdims=True)
        v = jnp.mean((y - mu) ** 2, axis=(0, 1, 2), keepdims=True)
        return (y - mu) * g * jax.lax.rsqrt(v + _EPS) + b

    y = jax.nn.relu(bn(conv(x, w1), g1, b1))
    out = jax.nn.relu(bn(conv(y, w2), g2, b2) + x)
    return jnp.transpose(out, (0, 3, 1, 2))


if __name__ == "__main__":
    key = jax.random.PRNGKey(0)
    k_x, k_w1, k_w2 = jax.random.split(key, 3)

    N, C, H, W = 2, 4, 16, 16            # small shapes: batch=2, channels=4, 16x16
    x = jax.random.normal(k_x, (N, C, H, W), dtype=jnp.float32)

    # Deterministic parameter init (shapes from the module's __init__):
    # conv3x3 weights in HWIO, BN gamma=1 / beta=0 (PyTorch default init).
    w1 = 0.1 * jax.random.normal(k_w1, (3, 3, C, C), dtype=jnp.float32)
    w2 = 0.1 * jax.random.normal(k_w2, (3, 3, C, C), dtype=jnp.float32)
    g1 = jnp.ones((C,), jnp.float32)
    b1 = jnp.zeros((C,), jnp.float32)
    g2 = jnp.ones((C,), jnp.float32)
    b2 = jnp.zeros((C,), jnp.float32)
    params = (w1, g1, b1, w2, g2, b2)

    out = jax.block_until_ready(residual_block_forward(x, params))
    ref = jax.block_until_ready(_ref_forward(x, params))

    assert out.shape == (N, C, H, W)
    assert jnp.allclose(out, ref, atol=2e-4, rtol=2e-4), \
        f"max abs err = {jnp.max(jnp.abs(out - ref))}"

    print("KERNEL_OK")
</pallas_src>

<mosaic_0001>
module attributes {stable_mosaic.version = 11 : i64} {
  func.func @kernel(%arg0: memref<8x1024xf32, #tpu.memory_space<vmem>>, %arg1: memref<1x768xf32, #tpu.memory_space<vmem>>, %arg2: memref<9x8x8xf32, #tpu.memory_space<vmem>>, %arg3: memref<8x1xf32, #tpu.memory_space<vmem>>, %arg4: memref<8x1xf32, #tpu.memory_space<vmem>>, %arg5: memref<9x8x8xf32, #tpu.memory_space<vmem>>, %arg6: memref<8x1xf32, #tpu.memory_space<vmem>>, %arg7: memref<8x1xf32, #tpu.memory_space<vmem>>, %arg8: memref<8x768xf32, #tpu.memory_space<vmem>>, %arg9: memref<8x1024xf32, #tpu.memory_space<vmem>>) attributes {dimension_semantics = [], scalar_prefetch = 0 : i64, scratch_operands = 1 : i64, tpu.core_type = #tpu.core_type<tc>} {
    %c0 = arith.constant 0 : index
    %c0_0 = arith.constant 0 : index
    %0 = vector.load %arg1[%c0, %c0_0] : memref<1x768xf32, #tpu.memory_space<vmem>>, vector<1x768xf32>
    %c0_1 = arith.constant 0 : index
    %c109 = arith.constant 109 : index
    %1 = vector.load %arg0[%c0_1, %c109] : memref<8x1024xf32, #tpu.memory_space<vmem>>, vector<8x768xf32>
    %c0_2 = arith.constant 0 : index
    %c0_3 = arith.constant 0 : index
    %c0_4 = arith.constant 0 : index
    %2 = vector.load %arg2[%c0_2, %c0_3, %c0_4] : memref<9x8x8xf32, #tpu.memory_space<vmem>>, vector<1x8x8xf32>
    %3 = vector.shape_cast %2 : vector<1x8x8xf32> to vector<8x8xf32>
    %cst = arith.constant dense<0.000000e+00> : vector<8x768xf32>
    %4 = tpu.matmul %3, %1, %cst {dimension_numbers = #tpu.dot_dimension_numbers<[1], [0], [0], [1], [0, 0, 1, 1], [], []>} : vector<8x8xf32>, vector<8x768xf32>, vector<8x768xf32> -> vector<8x768xf32>
    %c0_5 = arith.constant 0 : index
    %c110 = arith.constant 110 : index
    %5 = vector.load %arg0[%c0_5, %c110] : memref<8x1024xf32, #tpu.memory_space<vmem>>, vector<8x768xf32>
    %c1 = arith.constant 1 : index
    %c0_6 = arith.constant 0 : index
    %c0_7 = arith.constant 0 : index
    %6 = vector.load %arg2[%c1, %c0_6, %c0_7] : memref<9x8x8xf32, #tpu.memory_space<vmem>>, vector<1x8x8xf32>
    %7 = vector.shape_cast %6 : vector<1x8x8xf32> to vector<8x8xf32>
    %cst_8 = arith.constant dense<0.000000e+00> : vector<8x768xf32>
    %8 = tpu.matmul %7, %5, %cst_8 {dimension_numbers = #tpu.dot_dimension_numbers<[1], [0], [0], [1], [0, 0, 1, 1], [], []>} : vector<8x8xf32>, vector<8x768xf32>, vector<8x768xf32> -> vector<8x768xf32>
    %9 = arith.addf %4, %8 : vector<8x768xf32>
    %c0_9 = arith.constant 0 : index
    %c111 = arith.constant 111 : index
    %10 = vector.load %arg0[%c0_9, %c111] : memref<8x1024xf32, #tpu.memory_space<vmem>>, vector<8x768xf32>
    %c2 = arith.constant 2 : index
    %c0_10 = arith.constant 0 : index
    %c0_11 = arith.constant 0 : index
    %11 = vector.load %arg2[%c2, %c0_10, %c0_11] : memref<9x8x8xf32, #tpu.memory_space<vmem>>, vector<1x8x8xf32>
    %12 = vector.shape_cast %11 : vector<1x8x8xf32> to vector<8x8xf32>
    %cst_12 = arith.constant dense<0.000000e+00> : vector<8x768xf32>
    %13 = tpu.matmul %12, %10, %cst_12 {dimension_numbers = #tpu.dot_dimension_numbers<[1], [0], [0], [1], [0, 0, 1, 1], [], []>} : vector<8x8xf32>, vector<8x768xf32>, vector<8x768xf32> -> vector<8x768xf32>
    %14 = arith.addf %9, %13 : vector<8x768xf32>
    %c0_13 = arith.constant 0 : index
    %c127 = arith.constant 127 : index
    %15 = vector.load %arg0[%c0_13, %c127] : memref<8x1024xf32, #tpu.memory_space<vmem>>, vector<8x768xf32>
    %c3 = arith.constant 3 : index
    %c0_14 = arith.constant 0 : index
    %c0_15 = arith.constant 0 : index
    %16 = vector.load %arg2[%c3, %c0_14, %c0_15] : memref<9x8x8xf32, #tpu.memory_space<vmem>>, vector<1x8x8xf32>
    %17 = vector.shape_cast %16 : vector<1x8x8xf32> to vector<8x8xf32>
    %cst_16 = arith.constant dense<0.000000e+00> : vector<8x768xf32>
    %18 = tpu.matmul %17, %15, %cst_16 {dimension_numbers = #tpu.dot_dimension_numbers<[1], [0], [0], [1], [0, 0, 1, 1], [], []>} : vector<8x8xf32>, vector<8x768xf32>, vector<8x768xf32> -> vector<8x768xf32>
    %19 = arith.addf %14, %18 : vector<8x768xf32>
    %c0_17 = arith.constant 0 : index
    %c128 = arith.constant 128 : index
    %20 = vector.load %arg0[%c0_17, %c128] : memref<8x1024xf32, #tpu.memory_space<vmem>>, vector<8x768xf32>
    %c4 = arith.constant 4 : index
    %c0_18 = arith.constant 0 : index
    %c0_19 = arith.constant 0 : index
    %21 = vector.load %arg2[%c4, %c0_18, %c0_19] : memref<9x8x8xf32, #tpu.memory_space<vmem>>, vector<1x8x8xf32>
    %22 = vector.shape_cast %21 : vector<1x8x8xf32> to vector<8x8xf32>
    %cst_20 = arith.constant dense<0.000000e+00> : vector<8x768xf32>
    %23 = tpu.matmul %22, %20, %cst_20 {dimension_numbers = #tpu.dot_dimension_numbers<[1], [0], [0], [1], [0, 0, 1, 1], [], []>} : vector<8x8xf32>, vector<8x768xf32>, vector<8x768xf32> -> vector<8x768xf32>
    %24 = arith.addf %19, %23 : vector<8x768xf32>
    %c0_21 = arith.constant 0 : index
    %c129 = arith.constant 129 : index
    %25 = vector.load %arg0[%c0_21, %c129] : memref<8x1024xf32, #tpu.memory_space<vmem>>, vector<8x768xf32>
    %c5 = arith.constant 5 : index
    %c0_22 = arith.constant 0 : index
    %c0_23 = arith.constant 0 : index
    %26 = vector.load %arg2[%c5, %c0_22, %c0_23] : memref<9x8x8xf32, #tpu.memory_space<vmem>>, vector<1x8x8xf32>
    %27 = vector.shape_cast %26 : vector<1x8x8xf32> to vector<8x8xf32>
    %cst_24 = arith.constant dense<0.000000e+00> : vector<8x768xf32>
    %28 = tpu.matmul %27, %25, %cst_24 {dimension_numbers = #tpu.dot_dimension_numbers<[1], [0], [0], [1], [0, 0, 1, 1], [], []>} : vector<8x8xf32>, vector<8x768xf32>, vector<8x768xf32> -> vector<8x768xf32>
    %29 = arith.addf %24, %28 : vector<8x768xf32>
    %c0_25 = arith.constant 0 : index
    %c145 = arith.constant 145 : index
    %30 = vector.load %arg0[%c0_25, %c145] : memref<8x1024xf32, #tpu.memory_space<vmem>>, vector<8x768xf32>
    %c6 = arith.constant 6 : index
    %c0_26 = arith.constant 0 : index
    %c0_27 = arith.constant 0 : index
    %31 = vector.load %arg2[%c6, %c0_26, %c0_27] : memref<9x8x8xf32, #tpu.memory_space<vmem>>, vector<1x8x8xf32>
    %32 = vector.shape_cast %31 : vector<1x8x8xf32> to vector<8x8xf32>
    %cst_28 = arith.constant dense<0.000000e+00> : vector<8x768xf32>
    %33 = tpu.matmul %32, %30, %cst_28 {dimension_numbers = #tpu.dot_dimension_numbers<[1], [0], [0], [1], [0, 0, 1, 1], [], []>} : vector<8x8xf32>, vector<8x768xf32>, vector<8x768xf32> -> vector<8x768xf32>
    %34 = arith.addf %29, %33 : vector<8x768xf32>
    %c0_29 = arith.constant 0 : index
    %c146 = arith.constant 146 : index
    %35 = vector.load %arg0[%c0_29, %c146] : memref<8x1024xf32, #tpu.memory_space<vmem>>, vector<8x768xf32>
    %c7 = arith.constant 7 : index
    %c0_30 = arith.constant 0 : index
    %c0_31 = arith.constant 0 : index
    %36 = vector.load %arg2[%c7, %c0_30, %c0_31] : memref<9x8x8xf32, #tpu.memory_space<vmem>>, vector<1x8x8xf32>
    %37 = vector.shape_cast %36 : vector<1x8x8xf32> to vector<8x8xf32>
    %cst_32 = arith.constant dense<0.000000e+00> : vector<8x768xf32>
    %38 = tpu.matmul %37, %35, %cst_32 {dimension_numbers = #tpu.dot_dimension_numbers<[1], [0], [0], [1], [0, 0, 1, 1], [], []>} : vector<8x8xf32>, vector<8x768xf32>, vector<8x768xf32> -> vector<8x768xf32>
    %39 = arith.addf %34, %38 : vector<8x768xf32>
    %c0_33 = arith.constant 0 : index
    %c147 = arith.constant 147 : index
    %40 = vector.load %arg0[%c0_33, %c147] : memref<8x1024xf32, #tpu.memory_space<vmem>>, vector<8x768xf32>
    %c8 = arith.constant 8 : index
    %c0_34 = arith.constant 0 : index
    %c0_35 = arith.constant 0 : index
    %41 = vector.load %arg2[%c8, %c0_34, %c0_35] : memref<9x8x8xf32, #tpu.memory_space<vmem>>, vector<1x8x8xf32>
    %42 = vector.shape_cast %41 : vector<1x8x8xf32> to vector<8x8xf32>
    %cst_36 = arith.constant dense<0.000000e+00> : vector<8x768xf32>
    %43 = tpu.matmul %42, %40, %cst_36 {dimension_numbers = #tpu.dot_dimension_numbers<[1], [0], [0], [1], [0, 0, 1, 1], [], []>} : vector<8x8xf32>, vector<8x768xf32>, vector<8x768xf32> -> vector<8x768xf32>
    %44 = arith.addf %39, %43 : vector<8x768xf32>
    %45 = vector.broadcast %0 : vector<1x768xf32> to vector<8x768xf32>
    %46 = arith.mulf %44, %45 : vector<8x768xf32>
    %cst_37 = arith.constant dense<0.000000e+00> : vector<8xf32>
    %47 = vector.multi_reduction <add>, %46, %cst_37 [1] : vector<8x768xf32> to vector<8xf32>
    %48 = vector.shape_cast %47 : vector<8xf32> to vector<8x1xf32>
    %cst_38 = arith.constant 0.001953125 : f32
    %49 = vector.broadcast %cst_38 : f32 to vector<8x1xf32>
    %50 = arith.mulf %48, %49 : vector<8x1xf32>
    %51 = vector.broadcast %50 : vector<8x1xf32> to vector<8x768xf32>
    %52 = arith.subf %44, %51 : vector<8x768xf32>
    %53 = vector.broadcast %0 : vector<1x768xf32> to vector<8x768xf32>
    %54 = arith.mulf %52, %53 : vector<8x768xf32>
    %55 = arith.mulf %54, %54 : vector<8x768xf32>
    %cst_39 = arith.constant dense<0.000000e+00> : vector<8xf32>
    %56 = vector.multi_reduction <add>, %55, %cst_39 [1] : vector<8x768xf32> to vector<8xf32>
    %57 = vector.shape_cast %56 : vector<8xf32> to vector<8x1xf32>
    %cst_40 = arith.constant 0.001953125 : f32
    %58 = vector.broadcast %cst_40 : f32 to vector<8x1xf32>
    %59 = arith.mulf %57, %58 : vector<8x1xf32>
    %c0_41 = arith.constant 0 : index
    %c0_42 = arith.constant 0 : index
    %60 = vector.load %arg3[%c0_41, %c0_42] : memref<8x1xf32, #tpu.memory_space<vmem>>, vector<8x1xf32>
    %cst_43 = arith.constant 9.99999974E-6 : f32
    %61 = vector.broadcast %cst_43 : f32 to vector<8x1xf32>
    %62 = arith.addf %59, %61 : vector<8x1xf32>
    %63 = math.rsqrt %62 : vector<8x1xf32>
    %64 = arith.mulf %60, %63 : vector<8x1xf32>
    %65 = vector.broadcast %50 : vector<8x1xf32> to vector<8x768xf32>
    %66 = arith.subf %44, %65 : vector<8x768xf32>
    %67 = vector.broadcast %64 : vector<8x1xf32> to vector<8x768xf32>
    %68 = arith.mulf %66, %67 : vector<8x768xf32>
    %c0_44 = arith.constant 0 : index
    %c0_45 = arith.constant 0 : index
    %69 = vector.load %arg4[%c0_44, %c0_45] : memref<8x1xf32, #tpu.memory_space<vmem>>, vector<8x1xf32>
    %70 = vector.broadcast %69 : vector<8x1xf32> to vector<8x768xf32>
    %71 = arith.addf %68, %70 : vector<8x768xf32>
    %cst_46 = arith.constant 0.000000e+00 : f32
    %72 = vector.broadcast %cst_46 : f32 to vector<8x768xf32>
    %73 = arith.maximumf %71, %72 : vector<8x768xf32>
    %74 = vector.broadcast %0 : vector<1x768xf32> to vector<8x768xf32>
    %75 = arith.mulf %73, %74 : vector<8x768xf32>
    %cst_47 = arith.constant 0.000000e+00 : f32
    %76 = vector.broadcast %cst_47 : f32 to vector<8x128xf32>
    %c0_48 = arith.constant 0 : index
    %c0_49 = arith.constant 0 : index
    %77 = vector.load %arg9[%c0_48, %c0_49] : memref<8x1024xf32, #tpu.memory_space<vmem>>, vector<8x128xf32>
    tpu.vector_store %arg9[%c0_48, %c0_49], %76 {strides = array<i32>} : memref<8x1024xf32, #tpu.memory_space<vmem>>, vector<8x128xf32>,
    %cst_50 = arith.constant 0.000000e+00 : f32
    %78 = vector.broadcast %cst_50 : f32 to vector<8x128xf32>
    %c0_51 = arith.constant 0 : index
    %c896 = arith.constant 896 : index
    %79 = vector.load %arg9[%c0_51, %c896] : memref<8x1024xf32, #tpu.memory_space<vmem>>, vector<8x128xf32>
    tpu.vector_store %arg9[%c0_51, %c896], %78 {strides = array<i32>} : memref<8x1024xf32, #tpu.memory_space<vmem>>, vector<8x128xf32>,
    %c0_52 = arith.constant 0 : index
    %c128_53 = arith.constant 128 : index
    %80 = vector.load %arg9[%c0_52, %c128_53] : memref<8x1024xf32, #tpu.memory_space<vmem>>, vector<8x768xf32>
    tpu.vector_store %arg9[%c0_52, %c128_53], %75 {strides = array<i32>} : memref<8x1024xf32, #tpu.memory_space<vmem>>, vector<8x768xf32>,
    %c0_54 = arith.constant 0 : index
    %c109_55 = arith.constant 109 : index
    %81 = vector.load %arg9[%c0_54, %c109_55] : memref<8x1024xf32, #tpu.memory_space<vmem>>, vector<8x768xf32>
    %c0_56 = arith.constant 0 : index
    %c0_57 = arith.constant 0 : index
    %c0_58 = arith.constant 0 : index
    %82 = vector.load %arg5[%c0_56, %c0_57, %c0_58] : memref<9x8x8xf32, #tpu.memory_space<vmem>>, vector<1x8x8xf32>
    %83 = vector.shape_cast %82 : vector<1x8x8xf32> to vector<8x8xf32>
    %cst_59 = arith.constant dense<0.000000e+00> : vector<8x768xf32>
    %84 = tpu.matmul %83, %81, %cst_59 {dimension_numbers = #tpu.dot_dimension_numbers<[1], [0], [0], [1], [0, 0, 1, 1], [], []>} : vector<8x8xf32>, vector<8x768xf32>, vector<8x768xf32> -> vector<8x768xf32>
    %c0_60 = arith.constant 0 : index
    %c110_61 = arith.constant 110 : index
    %85 = vector.load %arg9[%c0_60, %c110_61] : memref<8x1024xf32, #tpu.memory_space<vmem>>, vector<8x768xf32>
    %c1_62 = arith.constant 1 : index
    %c0_63 = arith.constant 0 : index
    %c0_64 = arith.constant 0 : index
    %86 = vector.load %arg5[%c1_62, %c0_63, %c0_64] : memref<9x8x8xf32, #tpu.memory_space<vmem>>, vector<1x8x8xf32>
    %87 = vector.shape_cast %86 : vector<1x8x8xf32> to vector<8x8xf32>
    %cst_65 = arith.constant dense<0.000000e+00> : vector<8x768xf32>
    %88 = tpu.matmul %87, %85, %cst_65 {dimension_numbers = #tpu.dot_dimension_numbers<[1], [0], [0], [1], [0, 0, 1, 1], [], []>} : vector<8x8xf32>, vector<8x768xf32>, vector<8x768xf32> -> vector<8x768xf32>
    %89 = arith.addf %84, %88 : vector<8x768xf32>
    %c0_66 = arith.constant 0 : index
    %c111_67 = arith.constant 111 : index
    %90 = vector.load %arg9[%c0_66, %c111_67] : memref<8x1024xf32, #tpu.memory_space<vmem>>, vector<8x768xf32>
    %c2_68 = arith.constant 2 : index
    %c0_69 = arith.constant 0 : index
    %c0_70 = arith.constant 0 : index
    %91 = vector.load %arg5[%c2_68, %c0_69, %c0_70] : memref<9x8x8xf32, #tpu.memory_space<vmem>>, vector<1x8x8xf32>
    %92 = vector.shape_cast %91 : vector<1x8x8xf32> to vector<8x8xf32>
    %cst_71 = arith.constant dense<0.000000e+00> : vector<8x768xf32>
    %93 = tpu.matmul %92, %90, %cst_71 {dimension_numbers = #tpu.dot_dimension_numbers<[1], [0], [0], [1], [0, 0, 1, 1], [], []>} : vector<8x8xf32>, vector<8x768xf32>, vector<8x768xf32> -> vector<8x768xf32>
    %94 = arith.addf %89, %93 : vector<8x768xf32>
    %c0_72 = arith.constant 0 : index
    %c127_73 = arith.constant 127 : index
    %95 = vector.load %arg9[%c0_72, %c127_73] : memref<8x1024xf32, #tpu.memory_space<vmem>>, vector<8x768xf32>
    %c3_74 = arith.constant 3 : index
    %c0_75 = arith.constant 0 : index
    %c0_76 = arith.constant 0 : index
    %96 = vector.load %arg5[%c3_74, %c0_75, %c0_76] : memref<9x8x8xf32, #tpu.memory_space<vmem>>, vector<1x8x8xf32>
    %97 = vector.shape_cast %96 : vector<1x8x8xf32> to vector<8x8xf32>
    %cst_77 = arith.constant dense<0.000000e+00> : vector<8x768xf32>
    %98 = tpu.matmul %97, %95, %cst_77 {dimension_numbers = #tpu.dot_dimension_numbers<[1], [0], [0], [1], [0, 0, 1, 1], [], []>} : vector<8x8xf32>, vector<8x768xf32>, vector<8x768xf32> -> vector<8x768xf32>
    %99 = arith.addf %94, %98 : vector<8x768xf32>
    %c0_78 = arith.constant 0 : index
    %c128_79 = arith.constant 128 : index
    %100 = vector.load %arg9[%c0_78, %c128_79] : memref<8x1024xf32, #tpu.memory_space<vmem>>, vector<8x768xf32>
    %c4_80 = arith.constant 4 : index
    %c0_81 = arith.constant 0 : index
    %c0_82 = arith.constant 0 : index
    %101 = vector.load %arg5[%c4_80, %c0_81, %c0_82] : memref<9x8x8xf32, #tpu.memory_space<vmem>>, vector<1x8x8xf32>
    %102 = vector.shape_cast %101 : vector<1x8x8xf32> to vector<8x8xf32>
    %cst_83 = arith.constant dense<0.000000e+00> : vector<8x768xf32>
    %103 = tpu.matmul %102, %100, %cst_83 {dimension_numbers = #tpu.dot_dimension_numbers<[1], [0], [0], [1], [0, 0, 1, 1], [], []>} : vector<8x8xf32>, vector<8x768xf32>, vector<8x768xf32> -> vector<8x768xf32>
    %104 = arith.addf %99, %103 : vector<8x768xf32>
    %c0_84 = arith.constant 0 : index
    %c129_85 = arith.constant 129 : index
    %105 = vector.load %arg9[%c0_84, %c129_85] : memref<8x1024xf32, #tpu.memory_space<vmem>>, vector<8x768xf32>
    %c5_86 = arith.constant 5 : index
    %c0_87 = arith.constant 0 : index
    %c0_88 = arith.constant 0 : index
    %106 = vector.load %arg5[%c5_86, %c0_87, %c0_88] : memref<9x8x8xf32, #tpu.memory_space<vmem>>, vector<1x8x8xf32>
    %107 = vector.shape_cast %106 : vector<1x8x8xf32> to vector<8x8xf32>
    %cst_89 = arith.constant dense<0.000000e+00> : vector<8x768xf32>
    %108 = tpu.matmul %107, %105, %cst_89 {dimension_numbers = #tpu.dot_dimension_numbers<[1], [0], [0], [1], [0, 0, 1, 1], [], []>} : vector<8x8xf32>, vector<8x768xf32>, vector<8x768xf32> -> vector<8x768xf32>
    %109 = arith.addf %104, %108 : vector<8x768xf32>
    %c0_90 = arith.constant 0 : index
    %c145_91 = arith.constant 145 : index
    %110 = vector.load %arg9[%c0_90, %c145_91] : memref<8x1024xf32, #tpu.memory_space<vmem>>, vector<8x768xf32>
    %c6_92 = arith.constant 6 : index
    %c0_93 = arith.constant 0 : index
    %c0_94 = arith.constant 0 : index
    %111 = vector.load %arg5[%c6_92, %c0_93, %c0_94] : memref<9x8x8xf32, #tpu.memory_space<vmem>>, vector<1x8x8xf32>
    %112 = vector.shape_cast %111 : vector<1x8x8xf32> to vector<8x8xf32>
    %cst_95 = arith.constant dense<0.000000e+00> : vector<8x768xf32>
    %113 = tpu.matmul %112, %110, %cst_95 {dimension_numbers = #tpu.dot_dimension_numbers<[1], [0], [0], [1], [0, 0, 1, 1], [], []>} : vector<8x8xf32>, vector<8x768xf32>, vector<8x768xf32> -> vector<8x768xf32>
    %114 = arith.addf %109, %113 : vector<8x768xf32>
    %c0_96 = arith.constant 0 : index
    %c146_97 = arith.constant 146 : index
    %115 = vector.load %arg9[%c0_96, %c146_97] : memref<8x1024xf32, #tpu.memory_space<vmem>>, vector<8x768xf32>
    %c7_98 = arith.constant 7 : index
    %c0_99 = arith.constant 0 : index
    %c0_100 = arith.constant 0 : index
    %116 = vector.load %arg5[%c7_98, %c0_99, %c0_100] : memref<9x8x8xf32, #tpu.memory_space<vmem>>, vector<1x8x8xf32>
    %117 = vector.shape_cast %116 : vector<1x8x8xf32> to vector<8x8xf32>
    %cst_101 = arith.constant dense<0.000000e+00> : vector<8x768xf32>
    %118 = tpu.matmul %117, %115, %cst_101 {dimension_numbers = #tpu.dot_dimension_numbers<[1], [0], [0], [1], [0, 0, 1, 1], [], []>} : vector<8x8xf32>, vector<8x768xf32>, vector<8x768xf32> -> vector<8x768xf32>
    %119 = arith.addf %114, %118 : vector<8x768xf32>
    %c0_102 = arith.constant 0 : index
    %c147_103 = arith.constant 147 : index
    %120 = vector.load %arg9[%c0_102, %c147_103] : memref<8x1024xf32, #tpu.memory_space<vmem>>, vector<8x768xf32>
    %c8_104 = arith.constant 8 : index
    %c0_105 = arith.constant 0 : index
    %c0_106 = arith.constant 0 : index
    %121 = vector.load %arg5[%c8_104, %c0_105, %c0_106] : memref<9x8x8xf32, #tpu.memory_space<vmem>>, vector<1x8x8xf32>
    %122 = vector.shape_cast %121 : vector<1x8x8xf32> to vector<8x8xf32>
    %cst_107 = arith.constant dense<0.000000e+00> : vector<8x768xf32>
    %123 = tpu.matmul %122, %120, %cst_107 {dimension_numbers = #tpu.dot_dimension_numbers<[1], [0], [0], [1], [0, 0, 1, 1], [], []>} : vector<8x8xf32>, vector<8x768xf32>, vector<8x768xf32> -> vector<8x768xf32>
    %124 = arith.addf %119, %123 : vector<8x768xf32>
    %125 = vector.broadcast %0 : vector<1x768xf32> to vector<8x768xf32>
    %126 = arith.mulf %124, %125 : vector<8x768xf32>
    %cst_108 = arith.constant dense<0.000000e+00> : vector<8xf32>
    %127 = vector.multi_reduction <add>, %126, %cst_108 [1] : vector<8x768xf32> to vector<8xf32>
    %128 = vector.shape_cast %127 : vector<8xf32> to vector<8x1xf32>
    %cst_109 = arith.constant 0.001953125 : f32
    %129 = vector.broadcast %cst_109 : f32 to vector<8x1xf32>
    %130 = arith.mulf %128, %129 : vector<8x1xf32>
    %131 = vector.broadcast %130 : vector<8x1xf32> to vector<8x768xf32>
    %132 = arith.subf %124, %131 : vector<8x768xf32>
    %133 = vector.broadcast %0 : vector<1x768xf32> to vector<8x768xf32>
    %134 = arith.mulf %132, %133 : vector<8x768xf32>
    %135 = arith.mulf %134, %134 : vector<8x768xf32>
    %cst_110 = arith.constant dense<0.000000e+00> : vector<8xf32>
    %136 = vector.multi_reduction <add>, %135, %cst_110 [1] : vector<8x768xf32> to vector<8xf32>
    %137 = vector.shape_cast %136 : vector<8xf32> to vector<8x1xf32>
    %cst_111 = arith.constant 0.001953125 : f32
    %138 = vector.broadcast %cst_111 : f32 to vector<8x1xf32>
    %139 = arith.mulf %137, %138 : vector<8x1xf32>
    %c0_112 = arith.constant 0 : index
    %c0_113 = arith.constant 0 : index
    %140 = vector.load %arg6[%c0_112, %c0_113] : memref<8x1xf32, #tpu.memory_space<vmem>>, vector<8x1xf32>
    %cst_114 = arith.constant 9.99999974E-6 : f32
    %141 = vector.broadcast %cst_114 : f32 to vector<8x1xf32>
    %142 = arith.addf %139, %141 : vector<8x1xf32>
    %143 = math.rsqrt %142 : vector<8x1xf32>
    %144 = arith.mulf %140, %143 : vector<8x1xf32>
    %145 = vector.broadcast %130 : vector<8x1xf32> to vector<8x768xf32>
    %146 = arith.subf %124, %145 : vector<8x768xf32>
    %147 = vector.broadcast %144 : vector<8x1xf32> to vector<8x768xf32>
    %148 = arith.mulf %146, %147 : vector<8x768xf32>
    %c0_115 = arith.constant 0 : index
    %c0_116 = arith.constant 0 : index
    %149 = vector.load %arg7[%c0_115, %c0_116] : memref<8x1xf32, #tpu.memory_space<vmem>>, vector<8x1xf32>
    %150 = vector.broadcast %149 : vector<8x1xf32> to vector<8x768xf32>
    %151 = arith.addf %148, %150 : vector<8x768xf32>
    %c0_117 = arith.constant 0 : index
    %c128_118 = arith.constant 128 : index
    %152 = vector.load %arg0[%c0_117, %c128_118] : memref<8x1024xf32, #tpu.memory_space<vmem>>, vector<8x768xf32>
    %153 = arith.addf %151, %152 : vector<8x768xf32>
    %cst_119 = arith.constant 0.000000e+00 : f32
    %154 = vector.broadcast %cst_119 : f32 to vector<8x768xf32>
    %155 = arith.maximumf %153, %154 : vector<8x768xf32>
    %c0_120 = arith.constant 0 : index
    %c0_121 = arith.constant 0 : index
    %156 = vector.load %arg8[%c0_120, %c0_121] : memref<8x768xf32, #tpu.memory_space<vmem>>, vector<8x768xf32>
    tpu.vector_store %arg8[%c0_120, %c0_121], %155 {strides = array<i32>} : memref<8x768xf32, #tpu.memory_space<vmem>>, vector<8x768xf32>,
    return
  }
}

</mosaic_0001>

<bundles_post_ra>
// kernel: tpu_custom_call.1
= control target key start
LH: loop header
LB: loop body
LE: loop exit
PB: predicated region body
PF: predicated region fallthrough
CT: control target
= control target key end

     0   :  { %s4948_s9 = smov 18   ;;  %v4949_v4 = vmov 0.0   ;;  %s5631_s0 = inlined_call_operand.vmem [shape: f32[8,1024], index: 0, kind: input, shape index: {}]   ;;  %s5632_s1 = inlined_call_operand.vmem [shape: f32[1,768], index: 1, kind: input, shape index: {}]   ;;  %s5633_s2 = inlined_call_operand.vmem [shape: f32[9,8,8], index: 2, kind: input, shape index: {}]   ;;  %s5634_s3 = inlined_call_operand.vmem [shape: f32[8,1], index: 3, kind: input, shape index: {}]   ;;  %s5635_s4 = inlined_call_operand.vmem [shape: f32[8,1], index: 4, kind: input, shape index: {}]   ;;  %s5636_s5 = inlined_call_operand.vmem [shape: f32[9,8,8], index: 5, kind: input, shape index: {}]   ;;  %s5637_s6 = inlined_call_operand.vmem [shape: f32[8,1], index: 6, kind: input, shape index: {}]   ;;  %s5638_s7 = inlined_call_operand.vmem [shape: f32[8,1], index: 7, kind: input, shape index: {}]   ;;  %s5639_s8 = inlined_call_operand.hbm [shape: f32[8,768], index: 8, kind: output, shape index: {}]  }
   0x1   :  { %v5007_v0 = vld [vmem:[%s5631_s0 + $0x8] sm:$0xff]  ;;  %v31_v1 = vld [vmem:[%s5631_s0] sm:$0xff]  ;;  %v5018_v2 = vld [vmem:[%s5631_s0 + $0x10] sm:$0xff]  ;;  %143 = vmatprep.mubr.f32.mxu0 %v4949_v4  ;;  %2507 = vmatprep.mubr.f32.mxu1 %v4949_v4 }
   0x2   :  { %50 = vrot.lane.b32.xlu0 %v5007_v0, %s4948_s9  ;;  %48 = vrot.lane.b32.xlu1 %v31_v1, %s4948_s9  ;;  %v5023_v3 = vld [vmem:[%s5631_s0 + $0x18] sm:$0xff] }
   0x3   :  { %13 = vsyncpa [#allocation4], 0  ;;  %v5034_v5 = vld [vmem:[%s5631_s0 + $0x20] sm:$0xff]  ;;  %v5039_v6 = vld [vmem:[%s5631_s0 + $0x28] sm:$0xff]  ;;  %s4950_s20 = smov 19   ;;  %s4951_s21 = smov 17  }
   0x4   :  { %v5048_v7 = vld [vmem:[%s5631_s0 + $0x30] sm:$0xff]  ;;  %s4952_s22 = smov 1   ;;  %s4953_s23 = smov 127   ;;  %v1267_v8 = vld [vmem:[%s5631_s0 + $0x38] sm:$0xff]  ;;  %vm62_vm0 = vcmask 146432   ;;  %v4741_v14 = vld [vmem:[%s5633_s2 + $0x8] sm:$0xff] }
   0x5   :  { %s4954_s26 = smov 111   ;;  %s4955_s27 = smov 110   ;;  %vm75_vm1 = vcmask 64512   ;;  %vm306_vm2 = vcmask 154624   ;;  %v38_v28 = vld [vmem:[%s5633_s2] sm:$0xff]  ;;  %vm551_vm3 = vcmask 138240  }
   0x6   :  { %52 = vrot.lane.b32.xlu0 %v5018_v2, %s4948_s9  ;;  %54 = vrot.lane.b32.xlu1 %v5023_v3, %s4948_s9  ;;  %s4956_s28 = smov 109   ;;  %v4748_v42 = vld [vmem:[%s5633_s2 + $0x10] sm:$0xff]  ;;  %vm802_vm4 = vcmask 7168   ;;  %v4752_v56 = vld [vmem:[%s5633_s2 + $0x18] sm:$0xff]  ;;  %vm1291_vm5 = vcmask 1039360   ;;  %vm1542_vm6 = vcmask 908288  }
   0x7   :  { %vm1793_vm7 = vcmask 900096   ;;  %vm2044_vm8 = vcmask 891904  }
   0xa   :  { %56 = vrot.lane.b32.xlu0 %v5034_v5, %s4948_s9  ;;  %58 = vrot.lane.b32.xlu1 %v5039_v6, %s4948_s9 }
   0xe   :  { %60 = vrot.lane.b32.xlu0 %v5048_v7, %s4948_s9  ;;  %294 = vrot.lane.b32.xlu1 %v5007_v0, %s4950_s20 }
  0x12   :  { %296 = vrot.lane.b32.xlu0 %v5018_v2, %s4950_s20  ;;  %292 = vrot.lane.b32.xlu1 %v31_v1, %s4950_s20 }
  0x16   :  { %298 = vrot.lane.b32.xlu0 %v5023_v3, %s4950_s20  ;;  %300 = vrot.lane.b32.xlu1 %v5034_v5, %s4950_s20 }
  0x1a   :  { %302 = vrot.lane.b32.xlu0 %v5039_v6, %s4950_s20  ;;  %304 = vrot.lane.b32.xlu1 %v5048_v7, %s4950_s20 }
  0x1e   :  { %539 = vrot.lane.b32.xlu0 %v5007_v0, %s4951_s21  ;;  %541 = vrot.lane.b32.xlu1 %v5018_v2, %s4951_s21 }
  0x22   :  { %537 = vrot.lane.b32.xlu0 %v31_v1, %s4951_s21  ;;  %543 = vrot.lane.b32.xlu1 %v5023_v3, %s4951_s21 }
  0x26   :  { %545 = vrot.lane.b32.xlu0 %v5034_v5, %s4951_s21  ;;  %547 = vrot.lane.b32.xlu1 %v5039_v6, %s4951_s21 }
  0x2a   :  { %549 = vrot.lane.b32.xlu0 %v5048_v7, %s4951_s21  ;;  %790 = vrot.lane.b32.xlu1 %v5007_v0, %s4952_s22 }
  0x2e   :  { %792 = vrot.lane.b32.xlu0 %v5018_v2, %s4952_s22  ;;  %788 = vrot.lane.b32.xlu1 %v31_v1, %s4952_s22 }
  0x32   :  { %794 = vrot.lane.b32.xlu0 %v5023_v3, %s4952_s22  ;;  %796 = vrot.lane.b32.xlu1 %v5034_v5, %s4952_s22 }
  0x36   :  { %798 = vrot.lane.b32.xlu0 %v5039_v6, %s4952_s22  ;;  %800 = vrot.lane.b32.xlu1 %v5048_v7, %s4952_s22 }
  0x3a   :  { %1279 = vrot.lane.b32.xlu0 %v5018_v2, %s4953_s23  ;;  %1281 = vrot.lane.b32.xlu1 %v5023_v3, %s4953_s23 }
  0x3e   :  { %1277 = vrot.lane.b32.xlu0 %v5007_v0, %s4953_s23  ;;  %1283 = vrot.lane.b32.xlu1 %v5034_v5, %s4953_s23 }
  0x42   :  { %1285 = vrot.lane.b32.xlu0 %v5039_v6, %s4953_s23  ;;  %1287 = vrot.lane.b32.xlu1 %v5048_v7, %s4953_s23 }
  0x46   :  { %1289 = vrot.lane.b32.xlu0 %v1267_v8, %s4953_s23  ;;  %1530 = vrot.lane.b32.xlu1 %v5018_v2, %s4954_s26 }
  0x4a   :  { %1532 = vrot.lane.b32.xlu0 %v5023_v3, %s4954_s26  ;;  %1528 = vrot.lane.b32.xlu1 %v5007_v0, %s4954_s26 }
  0x4e   :  { %1534 = vrot.lane.b32.xlu0 %v5034_v5, %s4954_s26  ;;  %1536 = vrot.lane.b32.xlu1 %v5039_v6, %s4954_s26 }
  0x52   :  { %1538 = vrot.lane.b32.xlu0 %v5048_v7, %s4954_s26  ;;  %1540 = vrot.lane.b32.xlu1 %v1267_v8, %s4954_s26 }
  0x56   :  { %1781 = vrot.lane.b32.xlu0 %v5018_v2, %s4955_s27  ;;  %1783 = vrot.lane.b32.xlu1 %v5023_v3, %s4955_s27 }
  0x5a   :  { %1779 = vrot.lane.b32.xlu0 %v5007_v0, %s4955_s27  ;;  %1785 = vrot.lane.b32.xlu1 %v5034_v5, %s4955_s27 }
  0x5e   :  { %1787 = vrot.lane.b32.xlu0 %v5039_v6, %s4955_s27  ;;  %1789 = vrot.lane.b32.xlu1 %v5048_v7, %s4955_s27 }
  0x62   :  { %1791 = vrot.lane.b32.xlu0 %v1267_v8, %s4955_s27  ;;  %2032 = vrot.lane.b32.xlu1 %v5018_v2, %s4956_s28 }
  0x66   :  { %2034 = vrot.lane.b32.xlu0 %v5023_v3, %s4956_s28  ;;  %2030 = vrot.lane.b32.xlu1 %v5007_v0, %s4956_s28 }
  0x6a   :  { %2036 = vrot.lane.b32.xlu0 %v5034_v5, %s4956_s28  ;;  %2038 = vrot.lane.b32.xlu1 %v5039_v6, %s4956_s28 }
  0x6e   :  { %2040 = vrot.lane.b32.xlu0 %v5048_v7, %s4956_s28  ;;  %2042 = vrot.lane.b32.xlu1 %v1267_v8, %s4956_s28 }
  0x74   :  { %v51_v9 = vpop.permute.xlu0 %50  ;;  %v49_v10 = vpop.permute.xlu1 %48 }
  0x75   :  { %v63_v15 = vsel %vm62_vm0, %v49_v10, %v51_v9  ;;  %v4756_v10 = vld [vmem:[%s5633_s2 + $0x20] sm:$0xff] }
  0x78   :  { %v53_v11 = vpop.permute.xlu0 %52  ;;  %v55_v12 = vpop.permute.xlu1 %54 }
  0x79   :  { %v64_v13 = vsel %vm62_vm0, %v51_v9, %v53_v11  ;;  %v65_v19 = vsel %vm62_vm0, %v53_v11, %v55_v12 }
  0x7a   :  { %79 = vmatprep.subr.mxu0 %v64_v13 }
  0x7b   :  { %80 = vmatpush1.msra.mxu0 %v63_v15 }
  0x7c   :  { %v57_v16 = vpop.permute.xlu0 %56  ;;  %v59_v17 = vpop.permute.xlu1 %58  ;;  %4742 = vmatmul.mubr.msk.f32.vlgmr.msra.gmra.mrb[0].mxu0 %vm75_vm1, %v4741_v14 }
  0x7d   :  { %v66_v18 = vsel %vm62_vm0, %v55_v12, %v57_v16  ;;  %214 = vmatprep.mubr.f32.mxu0 %v4949_v4  ;;  %v67_v23 = vsel %vm62_vm0, %v57_v16, %v59_v17 }
  0x7e   :  { %150 = vmatprep.subr.mxu0 %v66_v18 }
  0x7f   :  { %151 = vmatpush1.msra.mxu0 %v65_v19 }
  0x80   :  { %v61_v20 = vpop.permute.xlu0 %60  ;;  %v295_v21 = vpop.permute.xlu1 %294  ;;  %4743 = vmatmul.mubr.msk.f32.vlgmr.msra.gmra.mrb[2].mxu0 %vm75_vm1, %v4741_v14 }
  0x81   :  { %v68_v22 = vsel %vm62_vm0, %v59_v17, %v61_v20  ;;  %285 = vmatprep.mubr.f32.mxu0 %v4949_v4 }
  0x82   :  { %221 = vmatprep.subr.mxu0 %v68_v22 }
  0x83   :  { %222 = vmatpush1.msra.mxu0 %v67_v23 }
  0x84   :  { %v297_v24 = vpop.permute.xlu0 %296  ;;  %v293_v25 = vpop.permute.xlu1 %292  ;;  %4744 = vmatmul.mubr.msk.f32.vlgmr.msra.gmra.mrb[4].mxu0 %vm75_vm1, %v4741_v14 }
  0x85   :  { %v307_v26 = vsel %vm306_vm2, %v293_v25, %v295_v21  ;;  %v308_v27 = vsel %vm306_vm2, %v295_v21, %v297_v24  ;;  %386 = vmatprep.mubr.f32.mxu0 %v4949_v4 }
  0x86   :  { %322 = vmatprep.subr.mxu0 %v308_v27  ;;  %v4764_v27 = vld [vmem:[%s5633_s2 + $0x30] sm:$0xff] }
  0x87   :  { %323 = vmatpush1.msra.mxu0 %v307_v26 }
  0x88   :  { %v299_v29 = vpop.permute.xlu0 %298  ;;  %v301_v30 = vpop.permute.xlu1 %300  ;;  %4745 = vmatmul.mubr.msk.f32.vlgmr.msra.gmra.mrb[0].mxu0 %vm75_vm1, %v38_v28 }
  0x89   :  { %v310_v31 = vsel %vm306_vm2, %v299_v29, %v301_v30  ;;  %v309_v32 = vsel %vm306_vm2, %v297_v24, %v299_v29  ;;  %457 = vmatprep.mubr.f32.mxu0 %v4949_v4 }
  0x8a   :  { %393 = vmatprep.subr.mxu0 %v310_v31 }
  0x8b   :  { %394 = vmatpush1.msra.mxu0 %v309_v32 }
  0x8c   :  { %v303_v33 = vpop.permute.xlu0 %302  ;;  %v305_v34 = vpop.permute.xlu1 %304  ;;  %4746 = vmatmul.mubr.msk.f32.vlgmr.msra.gmra.mrb[2].mxu0 %vm75_vm1, %v38_v28 }
  0x8d   :  { %v312_v35 = vsel %vm306_vm2, %v303_v33, %v305_v34  ;;  %v311_v36 = vsel %vm306_vm2, %v301_v30, %v303_v33  ;;  %528 = vmatprep.mubr.f32.mxu0 %v4949_v4 }
  0x8e   :  { %464 = vmatprep.subr.mxu0 %v312_v35 }
  0x8f   :  { %465 = vmatpush1.msra.mxu0 %v311_v36 }
  0x90   :  { %v540_v37 = vpop.permute.xlu0 %539  ;;  %v542_v38 = vpop.permute.xlu1 %541  ;;  %4747 = vmatmul.mubr.msk.f32.vlgmr.msra.gmra.mrb[4].mxu0 %vm75_vm1, %v38_v28 }
  0x91   :  { %v553_v39 = vsel %vm551_vm3, %v540_v37, %v542_v38  ;;  %631 = vmatprep.mubr.f32.mxu0 %v4949_v4 }
  0x92   :  { %567 = vmatprep.subr.mxu0 %v553_v39 }
  0x94   :  { %v538_v40 = vpop.permute.xlu0 %537  ;;  %v544_v41 = vpop.permute.xlu1 %543 }
  0x95   :  { %v552_v43 = vsel %vm551_vm3, %v538_v40, %v540_v37  ;;  %v554_v47 = vsel %vm551_vm3, %v542_v38, %v544_v41  ;;  %v4768_v40 = vld [vmem:[%s5633_s2 + $0x38] sm:$0xff] }
  0x96   :  { %568 = vmatpush1.msra.mxu0 %v552_v43 }
  0x97   :  { %4749 = vmatmul.mubr.msk.f32.vlgmr.msra.gmra.mrb[0].mxu0 %vm75_vm1, %v4748_v42 }
  0x98   :  { %v546_v44 = vpop.permute.xlu0 %545  ;;  %v548_v45 = vpop.permute.xlu1 %547  ;;  %702 = vmatprep.mubr.f32.mxu0 %v4949_v4 }
  0x99   :  { %v555_v46 = vsel %vm551_vm3, %v544_v41, %v546_v44  ;;  %v556_v51 = vsel %vm551_vm3, %v546_v44, %v548_v45 }
  0x9a   :  { %638 = vmatprep.subr.mxu0 %v555_v46 }
  0x9b   :  { %639 = vmatpush1.msra.mxu0 %v554_v47 }
  0x9c   :  { %v550_v48 = vpop.permute.xlu0 %549  ;;  %4750 = vmatmul.mubr.msk.f32.vlgmr.msra.gmra.mrb[2].mxu0 %vm75_vm1, %v4748_v42  ;;  %v791_v49 = vpop.permute.xlu1 %790 }
  0x9d   :  { %v557_v50 = vsel %vm551_vm3, %v548_v45, %v550_v48  ;;  %773 = vmatprep.mubr.f32.mxu0 %v4949_v4 }
  0x9e   :  { %709 = vmatprep.subr.mxu0 %v557_v50 }
  0x9f   :  { %710 = vmatpush1.msra.mxu0 %v556_v51 }
  0xa0   :  { %v793_v52 = vpop.permute.xlu0 %792  ;;  %4751 = vmatmul.mubr.msk.f32.vlgmr.msra.gmra.mrb[4].mxu0 %vm75_vm1, %v4748_v42  ;;  %v789_v53 = vpop.permute.xlu1 %788 }
  0xa1   :  { %v803_v54 = vsel %vm802_vm4, %v789_v53, %v791_v49  ;;  %v804_v55 = vsel %vm802_vm4, %v791_v49, %v793_v52  ;;  %882 = vmatprep.mubr.f32.mxu0 %v4949_v4  ;;  %v4772_v53 = vld [vmem:[%s5633_s2 + $0x40] sm:$0xff] }
  0xa2   :  { %818 = vmatprep.subr.mxu0 %v804_v55 }
  0xa3   :  { %819 = vmatpush1.msra.mxu0 %v803_v54 }
  0xa4   :  { %v795_v57 = vpop.permute.xlu0 %794  ;;  %4753 = vmatmul.mubr.msk.f32.vlgmr.msra.gmra.mrb[0].mxu0 %vm75_vm1, %v4752_v56  ;;  %v797_v58 = vpop.permute.xlu1 %796 }
  0xa5   :  { %v805_v59 = vsel %vm802_vm4, %v793_v52, %v795_v57  ;;  %v806_v60 = vsel %vm802_vm4, %v795_v57, %v797_v58  ;;  %953 = vmatprep.mubr.f32.mxu0 %v4949_v4 }
  0xa6   :  { %889 = vmatprep.subr.mxu0 %v806_v60 }
  0xa7   :  { %890 = vmatpush1.msra.mxu0 %v805_v59  ;;  %v2280_v59 = vlaneseq }
  0xa8   :  { %v799_v61 = vpop.permute.xlu0 %798  ;;  %4754 = vmatmul.mubr.msk.f32.vlgmr.msra.gmra.mrb[2].mxu0 %vm75_vm1, %v4752_v56  ;;  %v801_v62 = vpop.permute.xlu1 %800 }
  0xa9   :  { %v807_v63 = vsel %vm802_vm4, %v797_v58, %v799_v61  ;;  %v808_v1 = vsel %vm802_vm4, %v799_v61, %v801_v62  ;;  %1024 = vmatprep.mubr.f32.mxu0 %v4949_v4  ;;  %v2281_v60 = vshrl.u32 %v2280_v59, 7  ;;  %v30_v62 = vld [vmem:[%s5632_s1] sm:$0x3f] }
  0xaa   :  { %960 = vmatprep.subr.mxu0 %v808_v1 }
  0xab   :  { %961 = vmatpush1.msra.mxu0 %v807_v63  ;;  %v2282_v61 = vsub.s32 0, %v2281_v60  ;;  %v2286_v63 = vsub.s32 1, %v2281_v60 }
  0xac   :  { %v1280_v8 = vpop.permute.xlu0 %1279  ;;  %4755 = vmatmul.mubr.msk.f32.vlgmr.msra.gmra.mrb[4].mxu0 %vm75_vm1, %v4752_v56  ;;  %v1282_v9 = vpop.permute.xlu1 %1281  ;;  %1042 = vmatprep.subr.mxu0 %v5018_v2 }
  0xad   :  { %1043 = vmatpush1.msra.mxu0 %v5007_v0  ;;  %1106 = vmatprep.mubr.f32.mxu0 %v4949_v4  ;;  %v1293_v13 = vsel %vm1291_vm5, %v1280_v8, %v1282_v9  ;;  %v5283_v1 = vrot.slane %v30_v62, %v2282_v61 }
  0xae   :  { %1113 = vmatprep.subr.mxu0 %v5034_v5 }
  0xb0   :  { %v1278_v11 = vpop.permute.xlu0 %1277  ;;  %4757 = vmatmul.mubr.msk.f32.vlgmr.msra.gmra.mrb[0].mxu0 %vm75_vm1, %v4756_v10  ;;  %v1284_v12 = vpop.permute.xlu1 %1283 }
  0xb1   :  { %1114 = vmatpush1.msra.mxu0 %v5023_v3  ;;  %1177 = vmatprep.mubr.f32.mxu0 %v4949_v4  ;;  %v1292_v5 = vsel %vm1291_vm5, %v1278_v11, %v1280_v8  ;;  %v1294_v15 = vsel %vm1291_vm5, %v1282_v9, %v1284_v12  ;;  %v2290_v8 = vsub.s32 2, %v2281_v60  ;;  %v5285_v9 = vrot.slane %v30_v62, %v2286_v63 }
  0xb2   :  { %1184 = vmatprep.subr.mxu0 %v5048_v7 }
  0xb4   :  { %v1286_v0 = vpop.permute.xlu0 %1285  ;;  %4758 = vmatmul.mubr.msk.f32.vlgmr.msra.gmra.mrb[2].mxu0 %vm75_vm1, %v4756_v10  ;;  %v1288_v2 = vpop.permute.xlu1 %1287 }
  0xb5   :  { %1185 = vmatpush1.msra.mxu0 %v5039_v6  ;;  %1248 = vmatprep.mubr.f32.mxu0 %v4949_v4  ;;  %v1295_v7 = vsel %vm1291_vm5, %v1284_v12, %v1286_v0  ;;  %v4760_v6 = vld [vmem:[%s5633_s2 + $0x28] sm:$0xff]  ;;  %v1296_v19 = vsel %vm1291_vm5, %v1286_v0, %v1288_v2 }
  0xb6   :  { %1307 = vmatprep.subr.mxu0 %v1293_v13  ;;  %v2298_v13 = vsub.s32 4, %v2281_v60 }
  0xb8   :  { %v1290_v14 = vpop.permute.xlu0 %1289  ;;  %4759 = vmatmul.mubr.msk.f32.vlgmr.msra.gmra.mrb[4].mxu0 %vm75_vm1, %v4756_v10  ;;  %v1531_v3 = vpop.permute.xlu1 %1530  ;;  %v2294_v10 = vsub.s32 3, %v2281_v60 }
  0xb9   :  { %1308 = vmatpush1.msra.mxu0 %v1292_v5  ;;  %1371 = vmatprep.mubr.f32.mxu0 %v4949_v4  ;;  %v1297_v18 = vsel %vm1291_vm5, %v1288_v2, %v1290_v14  ;;  %v5288_v2 = vrot.slane %v30_v62, %v2290_v8 }
  0xba   :  { %1378 = vmatprep.subr.mxu0 %v1295_v7  ;;  %v5291_v14 = vrot.slane %v30_v62, %v2294_v10 }
  0xbc   :  { %v1533_v16 = vpop.permute.xlu0 %1532  ;;  %4761 = vmatmul.mubr.msk.f32.vlgmr.msra.gmra.mrb[0].mxu0 %vm75_vm1, %v4760_v6  ;;  %v1529_v17 = vpop.permute.xlu1 %1528 }
  0xbd   :  { %1379 = vmatpush1.msra.mxu0 %v1294_v15  ;;  %1442 = vmatprep.mubr.f32.mxu0 %v4949_v4  ;;  %v1544_v22 = vsel %vm1542_vm6, %v1531_v3, %v1533_v16  ;;  %v1543_v24 = vsel %vm1542_vm6, %v1529_v17, %v1531_v3  ;;  %v2302_v3 = vsub.s32 5, %v2281_v60  ;;  %v5294_v17 = vrot.slane %v30_v62, %v2298_v13 }
  0xbe   :  { %1449 = vmatprep.subr.mxu0 %v1297_v18 }
  0xc0   :  { %v1535_v20 = vpop.permute.xlu0 %1534  ;;  %4762 = vmatmul.mubr.msk.f32.vlgmr.msra.gmra.mrb[2].mxu0 %vm75_vm1, %v4760_v6  ;;  %v1537_v21 = vpop.permute.xlu1 %1536 }
  0xc1   :  { %1450 = vmatpush1.msra.mxu0 %v1296_v19  ;;  %1513 = vmatprep.mubr.f32.mxu0 %v4949_v4  ;;  %v1546_v23 = vsel %vm1542_vm6, %v1535_v20, %v1537_v21  ;;  %v1545_v29 = vsel %vm1542_vm6, %v1533_v16, %v1535_v20  ;;  %v5297_v19 = vrot.slane %v30_v62, %v2302_v3 }
  0xc2   :  { %1558 = vmatprep.subr.mxu0 %v1544_v22 }
  0xc4   :  { %v1539_v25 = vpop.permute.xlu0 %1538  ;;  %4763 = vmatmul.mubr.msk.f32.vlgmr.msra.gmra.mrb[4].mxu0 %vm75_vm1, %v4760_v6  ;;  %v1541_v26 = vpop.permute.xlu1 %1540 }
  0xc5   :  { %1559 = vmatpush1.msra.mxu0 %v1543_v24  ;;  %1622 = vmatprep.mubr.f32.mxu0 %v4949_v4  ;;  %v1548_v28 = vsel %vm1542_vm6, %v1539_v25, %v1541_v26  ;;  %v1547_v33 = vsel %vm1542_vm6, %v1537_v21, %v1539_v25 }
  0xc6   :  { %1629 = vmatprep.subr.mxu0 %v1546_v23 }
  0xc8   :  { %v1782_v30 = vpop.permute.xlu0 %1781  ;;  %4765 = vmatmul.mubr.msk.f32.vlgmr.msra.gmra.mrb[0].mxu0 %vm75_vm1, %v4764_v27  ;;  %v1784_v31 = vpop.permute.xlu1 %1783 }
  0xc9   :  { %1630 = vmatpush1.msra.mxu0 %v1545_v29  ;;  %1693 = vmatprep.mubr.f32.mxu0 %v4949_v4  ;;  %v1795_v32 = vsel %vm1793_vm7, %v1782_v30, %v1784_v31 }
  0xca   :  { %1700 = vmatprep.subr.mxu0 %v1548_v28 }
  0xcc   :  { %v1780_v34 = vpop.permute.xlu0 %1779  ;;  %4766 = vmatmul.mubr.msk.f32.vlgmr.msra.gmra.mrb[2].mxu0 %vm75_vm1, %v4764_v27  ;;  %v1786_v35 = vpop.permute.xlu1 %1785 }
  0xcd   :  { %1701 = vmatpush1.msra.mxu0 %v1547_v33  ;;  %1764 = vmatprep.mubr.f32.mxu0 %v4949_v4  ;;  %v1794_v36 = vsel %vm1793_vm7, %v1780_v34, %v1782_v30  ;;  %v1796_v41 = vsel %vm1793_vm7, %v1784_v31, %v1786_v35 }
  0xce   :  { %1809 = vmatprep.subr.mxu0 %v1795_v32 }
  0xd0   :  { %v1788_v37 = vpop.permute.xlu0 %1787  ;;  %4767 = vmatmul.mubr.msk.f32.vlgmr.msra.gmra.mrb[4].mxu0 %vm75_vm1, %v4764_v27  ;;  %v1790_v38 = vpop.permute.xlu1 %1789 }
  0xd1   :  { %1810 = vmatpush1.msra.mxu0 %v1794_v36  ;;  %v1797_v39 = vsel %vm1793_vm7, %v1786_v35, %v1788_v37  ;;  %1873 = vmatprep.mubr.f32.mxu0 %v4949_v4  ;;  %v1798_v45 = vsel %vm1793_vm7, %v1788_v37, %v1790_v38 }
  0xd2   :  { %1880 = vmatprep.subr.mxu0 %v1797_v39 }
  0xd4   :  { %v1792_v42 = vpop.permute.xlu0 %1791  ;;  %4769 = vmatmul.mubr.msk.f32.vlgmr.msra.gmra.mrb[0].mxu0 %vm75_vm1, %v4768_v40  ;;  %v2033_v43 = vpop.permute.xlu1 %2032 }
  0xd5   :  { %1881 = vmatpush1.msra.mxu0 %v1796_v41  ;;  %v1799_v44 = vsel %vm1793_vm7, %v1790_v38, %v1792_v42  ;;  %1944 = vmatprep.mubr.f32.mxu0 %v4949_v4 }
  0xd6   :  { %1951 = vmatprep.subr.mxu0 %v1799_v44 }
  0xd8   :  { %v2035_v46 = vpop.permute.xlu0 %2034  ;;  %4770 = vmatmul.mubr.msk.f32.vlgmr.msra.gmra.mrb[2].mxu0 %vm75_vm1, %v4768_v40  ;;  %v2031_v47 = vpop.permute.xlu1 %2030 }
  0xd9   :  { %1952 = vmatpush1.msra.mxu0 %v1798_v45  ;;  %v2046_v48 = vsel %vm2044_vm8, %v2033_v43, %v2035_v46  ;;  %2015 = vmatprep.mubr.f32.mxu0 %v4949_v4  ;;  %v2045_v49 = vsel %vm2044_vm8, %v2031_v47, %v2033_v43 }
  0xda   :  { %2060 = vmatprep.subr.mxu0 %v2046_v48 }
  0xdc   :  { %v2037_v50 = vpop.permute.xlu0 %2036  ;;  %4771 = vmatmul.mubr.msk.f32.vlgmr.msra.gmra.mrb[4].mxu0 %vm75_vm1, %v4768_v40  ;;  %v2039_v51 = vpop.permute.xlu1 %2038 }
  0xdd   :  { %2061 = vmatpush1.msra.mxu0 %v2045_v49  ;;  %2124 = vmatprep.mubr.f32.mxu0 %v4949_v4  ;;  %v2048_v52 = vsel %vm2044_vm8, %v2037_v50, %v2039_v51  ;;  %v2047_v54 = vsel %vm2044_vm8, %v2035_v46, %v2037_v50 }
  0xde   :  { %2131 = vmatprep.subr.mxu0 %v2048_v52 }
  0xe0   :  { %v2041_v55 = vpop.permute.xlu0 %2040  ;;  %4773 = vmatmul.mubr.msk.f32.vlgmr.msra.gmra.mrb[0].mxu0 %vm75_vm1, %v4772_v53  ;;  %v2043_v56 = vpop.permute.xlu1 %2042 }
  0xe1   :  { %2132 = vmatpush1.msra.mxu0 %v2047_v54  ;;  %2195 = vmatprep.mubr.f32.mxu0 %v4949_v4  ;;  %v2050_v57 = vsel %vm2044_vm8, %v2041_v55, %v2043_v56  ;;  %v2049_v58 = vsel %vm2044_vm8, %v2039_v51, %v2041_v55  ;;  %v2365_v54 = vld [vmem:[%s5635_s4] sm:$0xff] }
  0xe2   :  { %2202 = vmatprep.subr.mxu0 %v2050_v57 }
  0xe4   :  { %4774 = vmatmul.mubr.msk.f32.vlgmr.msra.gmra.mrb[2].mxu0 %vm75_vm1, %v4772_v53 }
  0xe5   :  { %2203 = vmatpush1.msra.mxu0 %v2049_v58  ;;  %2266 = vmatprep.mubr.f32.mxu0 %v4949_v4  ;;  %v2350_v58 = vld [vmem:[%s5634_s3] sm:$0xff] }
  0xe8   :  { %4775 = vmatmul.mubr.msk.f32.vlgmr.msra.gmra.mrb[4].mxu0 %vm75_vm1, %v4772_v53  ;;  %v4957_v53 = vmov 0  }
  0xe9   :  { %4918 = vset.pattern.permute.xlu0 %v4957_v53  ;;  %4919 = vset.pattern.permute.xlu1 %v4957_v53 }
 0x1b3   :  { %v2126_v11 = vpop.f32.mrb[0].mxu0 }
 0x1b4   :  { %v2310_v12 = vmul.f32 %v5283_v1, %v2126_v11  ;;  %v2128_v0 = vpop.f32.mrb[1].mxu0 }
 0x1b5   :  { %v2311_v5 = vmul.f32 %v5285_v9, %v2128_v0 }
 0x1b7   :  { %v2316_v7 = vadd.f32 %v2311_v5, %v2310_v12  ;;  %v2197_v6 = vpop.f32.mrb[2].mxu0 }
 0x1b8   :  { %v2312_v15 = vmul.f32 %v5288_v2, %v2197_v6  ;;  %v2199_v16 = vpop.f32.mrb[3].mxu0 }
 0x1b9   :  { %v2313_v18 = vmul.f32 %v5291_v14, %v2199_v16 }
 0x1ba   :  { %v2317_v20 = vadd.f32 %v2316_v7, %v2312_v15 }
 0x1bb   :  { %v2268_v21 = vpop.f32.mrb[4].mxu0 }
 0x1bc   :  { %v2318_v22 = vadd.f32 %v2317_v20, %v2313_v18  ;;  %v2314_v23 = vmul.f32 %v5294_v17, %v2268_v21  ;;  %v2270_v24 = vpop.f32.mrb[5].mxu0 }
 0x1bd   :  { %v2315_v25 = vmul.f32 %v5297_v19, %v2270_v24 }
 0x1be   :  { %v2319_v26 = vadd.f32 %v2318_v22, %v2314_v23 }
 0x1c0   :  { %v2320_v27 = vadd.f32 %v2319_v26, %v2315_v25 }
 0x1c2   :  { %2321 = vadd.xlane.f32.xlu0 %v2320_v27 }
 0x24f   :  { %v2322_v28 = vpop.xlane.xlu0 %2321 }
 0x250   :  { %v2323_v29 = vmul.f32 0.001953125, %v2322_v28 }
 0x252   :  { %v2324_v30 = vsub.f32 %v2126_v11, %v2323_v29  ;;  %v2325_v31 = vsub.f32 %v2128_v0, %v2323_v29  ;;  %v2326_v32 = vsub.f32 %v2197_v6, %v2323_v29  ;;  %v2327_v33 = vsub.f32 %v2199_v16, %v2323_v29 }
 0x253   :  { %v2328_v34 = vsub.f32 %v2268_v21, %v2323_v29  ;;  %v2329_v38 = vsub.f32 %v2270_v24, %v2323_v29 }
 0x254   :  { %v2330_v35 = vmul.f32 %v2324_v30, %v5283_v1  ;;  %v2331_v36 = vmul.f32 %v2325_v31, %v5285_v9  ;;  %v2332_v37 = vmul.f32 %v2326_v32, %v5288_v2  ;;  %v2333_v39 = vmul.f32 %v2327_v33, %v5291_v14 }
 0x255   :  { %v2334_v42 = vmul.f32 %v2328_v34, %v5294_v17  ;;  %v2335_v45 = vmul.f32 %v2329_v38, %v5297_v19 }
 0x256   :  { %v2336_v40 = vmul.f32 %v2330_v35, %v2330_v35  ;;  %v2337_v41 = vmul.f32 %v2331_v36, %v2331_v36  ;;  %v2338_v43 = vmul.f32 %v2332_v37, %v2332_v37  ;;  %v2339_v46 = vmul.f32 %v2333_v39, %v2333_v39  ;;  %v4776_v39 = vld [vmem:[%s5636_s5 + $0x8] sm:$0xff] }
 0x257   :  { %v2340_v48 = vmul.f32 %v2334_v42, %v2334_v42  ;;  %v2341_v50 = vmul.f32 %v2335_v45, %v2335_v45 }
 0x258   :  { %v2342_v44 = vadd.f32 %v2337_v41, %v2336_v40 }
 0x25a   :  { %v2343_v47 = vadd.f32 %v2342_v44, %v2338_v43 }
 0x25c   :  { %v2344_v49 = vadd.f32 %v2343_v47, %v2339_v46 }
 0x25e   :  { %v2345_v51 = vadd.f32 %v2344_v49, %v2340_v48 }
 0x260   :  { %v2346_v52 = vadd.f32 %v2345_v51, %v2341_v50 }
 0x262   :  { %2347 = vadd.xlane.f32.xlu1 %v2346_v52 }
 0x273   :  { %2368 = vperm.xlu1 %4919, %v2365_v54  }
 0x277   :  { %2414 = vrot.lane.b32.xlu1 %v4949_v4, %s4948_s9 }
 0x27b   :  { %2656 = vrot.lane.b32.xlu1 %v4949_v4, %s4950_s20 }
 0x27f   :  { %3150 = vrot.lane.b32.xlu1 %v4949_v4, %s4952_s22 }
 0x2ef   :  { %v2348_v55 = vpop.xlane.xlu1 %2347 }
 0x2f0   :  { %v2349_v56 = vmul.f32 0.001953125, %v2348_v55  ;;  %v2404_v55 = vld [vmem:[%s5636_s5] sm:$0xff] }
 0x2f2   :  { %v2351_v57 = vadd.f32 1e-05, %v2349_v56 }
 0x2f3   :  { %v2369_v62 = vpop.permute.xlu1 %2368 }
 0x2f4   :  { %4920 = vrsqrt.f32 %v2351_v57 }
 0x2fe   :  { %v4921_v59 = vpop.eup %4920 }
 0x2ff   :  { %v2353_v60 = vmul.f32 %v4921_v59, %v2350_v58 }
 0x301   :  { %2356 = vperm.xlu0 %4918, %v2353_v60  }
 0x305   :  { %2900 = vrot.lane.b32.xlu0 %v4949_v4, %s4951_s21 }
 0x380   :  { %v2357_v61 = vpop.permute.xlu0 %2356 }
 0x381   :  { %v2359_v63 = vmul.f32 %v2357_v61, %v2324_v30  ;;  %v2360_v8 = vmul.f32 %v2357_v61, %v2325_v31  ;;  %v2364_v10 = vmul.f32 %v2357_v61, %v2329_v38  ;;  %v2361_v11 = vmul.f32 %v2357_v61, %v2326_v32  ;;  %v2415_v30 = vpop.permute.xlu1 %2414 }
 0x382   :  { %v2362_v7 = vmul.f32 %v2357_v61, %v2327_v33  ;;  %v2363_v18 = vmul.f32 %v2357_v61, %v2328_v34 }
 0x383   :  { %v2371_v12 = vadd.f32 %v2369_v62, %v2359_v63  ;;  %v2372_v0 = vadd.f32 %v2369_v62, %v2360_v8  ;;  %v2376_v13 = vadd.f32 %v2369_v62, %v2364_v10  ;;  %v2373_v6 = vadd.f32 %v2369_v62, %v2361_v11 }
 0x384   :  { %v2374_v21 = vadd.f32 %v2369_v62, %v2362_v7  ;;  %v2375_v24 = vadd.f32 %v2369_v62, %v2363_v18  ;;  %v2901_v33 = vpop.permute.xlu0 %2900 }
 0x385   :  { %v2377_v5 = vmax.f32 %v2371_v12, 0.0  ;;  %v2382_v3 = vmax.f32 %v2376_v13, 0.0  ;;  %v2378_v15 = vmax.f32 %v2372_v0, 0.0  ;;  %v2379_v22 = vmax.f32 %v2373_v6, 0.0  ;;  %v2657_v31 = vpop.permute.xlu1 %2656  ;;  %v4783_v12 = vld [vmem:[%s5636_s5 + $0x10] sm:$0xff] }
 0x386   :  { %v2380_v25 = vmax.f32 %v2374_v21, 0.0  ;;  %v2381_v27 = vmax.f32 %v2375_v24, 0.0 }
 0x387   :  { %v5322_v16 = vmul.f32 %v2377_v5, %v5283_v1  ;;  %v5325_v20 = vmul.f32 %v2382_v3, %v5297_v19  ;;  %v5332_v23 = vmul.f32 %v2378_v15, %v5285_v9  ;;  %v5339_v26 = vmul.f32 %v2379_v22, %v5288_v2 }
 0x388   :  { %v5346_v28 = vmul.f32 %v2380_v25, %v5291_v14  ;;  %v5349_v29 = vmul.f32 %v2381_v27, %v5294_v17 }
 0x389   :  { %2416 = vrot.lane.b32.xlu1 %v5322_v16, %s4948_s9  ;;  %2426 = vrot.lane.b32.xlu0 %v5325_v20, %s4948_s9  ;;  %v5443_v32 = vpop.permute.xlu1 %3150 }
 0x38d   :  { %2418 = vrot.lane.b32.xlu1 %v5332_v23, %s4948_s9  ;;  %2660 = vrot.lane.b32.xlu0 %v5332_v23, %s4950_s20 }
 0x391   :  { %2420 = vrot.lane.b32.xlu1 %v5339_v26, %s4948_s9  ;;  %2662 = vrot.lane.b32.xlu0 %v5339_v26, %s4950_s20 }
 0x395   :  { %2422 = vrot.lane.b32.xlu1 %v5346_v28, %s4948_s9  ;;  %2666 = vrot.lane.b32.xlu0 %v5349_v29, %s4950_s20 }
 0x399   :  { %2424 = vrot.lane.b32.xlu1 %v5349_v29, %s4948_s9  ;;  %2902 = vrot.lane.b32.xlu0 %v5322_v16, %s4951_s21 }
 0x39d   :  { %2658 = vrot.lane.b32.xlu1 %v5322_v16, %s4950_s20  ;;  %2908 = vrot.lane.b32.xlu0 %v5346_v28, %s4951_s21 }
 0x3a1   :  { %2664 = vrot.lane.b32.xlu1 %v5346_v28, %s4950_s20  ;;  %2912 = vrot.lane.b32.xlu0 %v5325_v20, %s4951_s21 }
 0x3a5   :  { %2668 = vrot.lane.b32.xlu1 %v5325_v20, %s4950_s20  ;;  %3154 = vrot.lane.b32.xlu0 %v5332_v23, %s4952_s22 }
 0x3a9   :  { %2904 = vrot.lane.b32.xlu1 %v5332_v23, %s4951_s21  ;;  %3156 = vrot.lane.b32.xlu0 %v5339_v26, %s4952_s22 }
 0x3ad   :  { %2906 = vrot.lane.b32.xlu1 %v5339_v26, %s4951_s21  ;;  %3160 = vrot.lane.b32.xlu0 %v5349_v29, %s4952_s22 }
 0x3b1   :  { %2910 = vrot.lane.b32.xlu1 %v5349_v29, %s4951_s21  ;;  %3650 = vrot.lane.b32.xlu0 %v4949_v4, %s4953_s23 }
 0x3b5   :  { %3152 = vrot.lane.b32.xlu1 %v5322_v16, %s4952_s22  ;;  %3640 = vrot.lane.b32.xlu0 %v5332_v23, %s4953_s23 }
 0x3b9   :  { %3158 = vrot.lane.b32.xlu1 %v5346_v28, %s4952_s22  ;;  %3638 = vrot.lane.b32.xlu0 %v5322_v16, %s4953_s23 }
 0x3bd   :  { %3162 = vrot.lane.b32.xlu1 %v5325_v20, %s4952_s22  ;;  %3646 = vrot.lane.b32.xlu0 %v5349_v29, %s4953_s23  ;;  %s4958_s22 = smov [#allocation3]  }
 0x3c1   :  { %3900 = vrot.lane.b32.xlu1 %v4949_v4, %s4954_s26  ;;  %3892 = vrot.lane.b32.xlu0 %v5339_v26, %s4954_s26 }
 0x3c5   :  { %3642 = vrot.lane.b32.xlu1 %v5339_v26, %s4953_s23  ;;  %3894 = vrot.lane.b32.xlu0 %v5346_v28, %s4954_s26 }
 0x3c9   :  { %3644 = vrot.lane.b32.xlu1 %v5346_v28, %s4953_s23  ;;  %3898 = vrot.lane.b32.xlu0 %v5325_v20, %s4954_s26 }
 0x3cd   :  { %3648 = vrot.lane.b32.xlu1 %v5325_v20, %s4953_s23  ;;  %4140 = vrot.lane.b32.xlu0 %v5332_v23, %s4955_s27  ;;  %s4733_s23 = sshll.u32 %s4958_s22, 4  ;;  %s4734_s23 = int_to_ptr.vmem [resolvable:$true] %s4733_s23 }
 0x3ce   :  { %p4929_p1 = scmp.lt.s32.totalorder %s4734_s23, %s4734_s23 }
 0x3d1   :  { %3890 = vrot.lane.b32.xlu1 %v5332_v23, %s4954_s26  ;;  %4138 = vrot.lane.b32.xlu0 %v5322_v16, %s4955_s27 }
 0x3d5   :  { %3888 = vrot.lane.b32.xlu1 %v5322_v16, %s4954_s26  ;;  %4146 = vrot.lane.b32.xlu0 %v5349_v29, %s4955_s27 }
 0x3d9   :  { %3896 = vrot.lane.b32.xlu1 %v5349_v29, %s4954_s26  ;;  %4150 = vrot.lane.b32.xlu0 %v4949_v4, %s4955_s27 }
 0x3dd   :  { %4142 = vrot.lane.b32.xlu1 %v5339_v26, %s4955_s27  ;;  %4392 = vrot.lane.b32.xlu0 %v5339_v26, %s4956_s28 }
 0x3e1   :  { %4144 = vrot.lane.b32.xlu1 %v5346_v28, %s4955_s27  ;;  %4394 = vrot.lane.b32.xlu0 %v5346_v28, %s4956_s28 }
 0x3e5   :  { %4148 = vrot.lane.b32.xlu1 %v5325_v20, %s4955_s27  ;;  %4398 = vrot.lane.b32.xlu0 %v5325_v20, %s4956_s28 }
 0x3e9   :  { %4390 = vrot.lane.b32.xlu1 %v5332_v23, %s4956_s28 }
 0x3ed   :  { %4388 = vrot.lane.b32.xlu1 %v5322_v16, %s4956_s28 }
 0x3f1   :  { %4396 = vrot.lane.b32.xlu1 %v5349_v29, %s4956_s28 }
 0x3f5   :  { %4400 = vrot.lane.b32.xlu1 %v4949_v4, %s4956_s28 }
 0x3fb   :  { %v2417_v34 = vpop.permute.xlu1 %2416  ;;  %v2427_v35 = vpop.permute.xlu0 %2426 }
 0x3fc   :  { %v2428_v40 = vsel %vm62_vm0, %v2415_v30, %v2417_v34  ;;  %v4787_v30 = vld [vmem:[%s5636_s5 + $0x18] sm:$0xff] }
 0x3ff   :  { %v2419_v36 = vpop.permute.xlu1 %2418  ;;  %v2661_v37 = vpop.permute.xlu0 %2660 }
 0x400   :  { %v2429_v38 = vsel %vm62_vm0, %v2417_v34, %v2419_v36 }
 0x401   :  { %2443 = vmatprep.subr.mxu1 %v2429_v38 }
 0x402   :  { %2444 = vmatpush1.msra.mxu1 %v2428_v40 }
 0x403   :  { %v2421_v41 = vpop.permute.xlu1 %2420  ;;  %4777 = vmatmul.mubr.msk.f32.vlgmr.msra.gmra.mrb[0].mxu1 %vm75_vm1, %v4776_v39  ;;  %v2663_v42 = vpop.permute.xlu0 %2662 }
 0x404   :  { %2578 = vmatprep.mubr.f32.mxu1 %v4949_v4  ;;  %v2430_v46 = vsel %vm62_vm0, %v2419_v36, %v2421_v41  ;;  %v2672_v59 = vsel %vm306_vm2, %v2661_v37, %v2663_v42 }
 0x407   :  { %v2423_v43 = vpop.permute.xlu1 %2422  ;;  %v2667_v44 = vpop.permute.xlu0 %2666 }
 0x408   :  { %v2431_v45 = vsel %vm62_vm0, %v2421_v41, %v2423_v43  ;;  %v4791_v41 = vld [vmem:[%s5636_s5 + $0x20] sm:$0xff] }
 0x409   :  { %2514 = vmatprep.subr.mxu1 %v2431_v45 }
 0x40a   :  { %2515 = vmatpush1.msra.mxu1 %v2430_v46 }
 0x40b   :  { %4778 = vmatmul.mubr.msk.f32.vlgmr.msra.gmra.mrb[2].mxu1 %vm75_vm1, %v4776_v39  ;;  %v2425_v47 = vpop.permute.xlu1 %2424  ;;  %v2903_v48 = vpop.permute.xlu0 %2902 }
 0x40c   :  { %v2432_v49 = vsel %vm62_vm0, %v2423_v43, %v2425_v47  ;;  %v2433_v50 = vsel %vm62_vm0, %v2425_v47, %v2427_v35  ;;  %2649 = vmatprep.mubr.f32.mxu1 %v4949_v4  ;;  %v2914_v0 = vsel %vm551_vm3, %v2901_v33, %v2903_v48 }
 0x40d   :  { %2585 = vmatprep.subr.mxu1 %v2433_v50 }
 0x40e   :  { %2586 = vmatpush1.msra.mxu1 %v2432_v49 }
 0x40f   :  { %4779 = vmatmul.mubr.msk.f32.vlgmr.msra.gmra.mrb[4].mxu1 %vm75_vm1, %v4776_v39  ;;  %v2659_v51 = vpop.permute.xlu1 %2658  ;;  %v2909_v52 = vpop.permute.xlu0 %2908 }
 0x410   :  { %v2670_v53 = vsel %vm306_vm2, %v2657_v31, %v2659_v51  ;;  %v2671_v54 = vsel %vm306_vm2, %v2659_v51, %v2661_v37  ;;  %2749 = vmatprep.mubr.f32.mxu1 %v4949_v4 }
 0x411   :  { %2685 = vmatprep.subr.mxu1 %v2671_v54 }
 0x412   :  { %2686 = vmatpush1.msra.mxu1 %v2670_v53 }
 0x413   :  { %4780 = vmatmul.mubr.msk.f32.vlgmr.msra.gmra.mrb[0].mxu1 %vm75_vm1, %v2404_v55  ;;  %v2665_v56 = vpop.permute.xlu1 %2664  ;;  %v2913_v57 = vpop.permute.xlu0 %2912 }
 0x414   :  { %v2673_v58 = vsel %vm306_vm2, %v2663_v42, %v2665_v56  ;;  %2820 = vmatprep.mubr.f32.mxu1 %v4949_v4  ;;  %v2674_v63 = vsel %vm306_vm2, %v2665_v56, %v2667_v44  ;;  %v4799_v56 = vld [vmem:[%s5636_s5 + $0x30] sm:$0xff] }
 0x415   :  { %2756 = vmatprep.subr.mxu1 %v2673_v58 }
 0x416   :  { %2757 = vmatpush1.msra.mxu1 %v2672_v59 }
 0x417   :  { %4781 = vmatmul.mubr.msk.f32.vlgmr.msra.gmra.mrb[2].mxu1 %vm75_vm1, %v2404_v55  ;;  %v2669_v60 = vpop.permute.xlu1 %2668  ;;  %v3155_v61 = vpop.permute.xlu0 %3154 }
 0x418   :  { %v2675_v62 = vsel %vm306_vm2, %v2667_v44, %v2669_v60  ;;  %2891 = vmatprep.mubr.f32.mxu1 %v4949_v4 }
 0x419   :  { %2827 = vmatprep.subr.mxu1 %v2675_v62 }
 0x41a   :  { %2828 = vmatpush1.msra.mxu1 %v2674_v63 }
 0x41b   :  { %4782 = vmatmul.mubr.msk.f32.vlgmr.msra.gmra.mrb[4].mxu1 %vm75_vm1, %v2404_v55  ;;  %v2905_v8 = vpop.permute.xlu1 %2904  ;;  %v3157_v10 = vpop.permute.xlu0 %3156 }
 0x41c   :  { %v2915_v11 = vsel %vm551_vm3, %v2903_v48, %v2905_v8  ;;  %2993 = vmatprep.mubr.f32.mxu1 %v4949_v4 }
 0x41d   :  { %2929 = vmatprep.subr.mxu1 %v2915_v11 }
 0x41e   :  { %2930 = vmatpush1.msra.mxu1 %v2914_v0  ;;  %v4803_v0 = vld [vmem:[%s5636_s5 + $0x38] sm:$0xff] }
 0x41f   :  { %4784 = vmatmul.mubr.msk.f32.vlgmr.msra.gmra.mrb[0].mxu1 %vm75_vm1, %v4783_v12  ;;  %v2907_v13 = vpop.permute.xlu1 %2906  ;;  %v3161_v5 = vpop.permute.xlu0 %3160 }
 0x420   :  { %v2916_v3 = vsel %vm551_vm3, %v2905_v8, %v2907_v13  ;;  %v2917_v7 = vsel %vm551_vm3, %v2907_v13, %v2909_v52  ;;  %3064 = vmatprep.mubr.f32.mxu1 %v4949_v4 }
 0x421   :  { %3000 = vmatprep.subr.mxu1 %v2917_v7 }
 0x422   :  { %3001 = vmatpush1.msra.mxu1 %v2916_v3 }
 0x423   :  { %4785 = vmatmul.mubr.msk.f32.vlgmr.msra.gmra.mrb[2].mxu1 %vm75_vm1, %v4783_v12  ;;  %v2911_v6 = vpop.permute.xlu1 %2910  ;;  %v5485_v15 = vpop.permute.xlu0 %3650 }
 0x424   :  { %v2918_v18 = vsel %vm551_vm3, %v2909_v52, %v2911_v6  ;;  %v2919_v21 = vsel %vm551_vm3, %v2911_v6, %v2913_v57  ;;  %3135 = vmatprep.mubr.f32.mxu1 %v4949_v4 }
 0x425   :  { %3071 = vmatprep.subr.mxu1 %v2919_v21 }
 0x426   :  { %3072 = vmatpush1.msra.mxu1 %v2918_v18 }
 0x427   :  { %4786 = vmatmul.mubr.msk.f32.vlgmr.msra.gmra.mrb[4].mxu1 %vm75_vm1, %v4783_v12  ;;  %v3153_v22 = vpop.permute.xlu1 %3152  ;;  %v3641_v24 = vpop.permute.xlu0 %3640 }
 0x428   :  { %v3164_v25 = vsel %vm802_vm4, %v5443_v32, %v3153_v22  ;;  %v3165_v27 = vsel %vm802_vm4, %v3153_v22, %v3155_v61  ;;  %3243 = vmatprep.mubr.f32.mxu1 %v4949_v4  ;;  %v3166_v32 = vsel %vm802_vm4, %v3155_v61, %v3157_v10 }
 0x429   :  { %3179 = vmatprep.subr.mxu1 %v3165_v27  ;;  %v4807_v27 = vld [vmem:[%s5636_s5 + $0x40] sm:$0xff] }
 0x42a   :  { %3180 = vmatpush1.msra.mxu1 %v3164_v25 }
 0x42b   :  { %4788 = vmatmul.mubr.msk.f32.vlgmr.msra.gmra.mrb[0].mxu1 %vm75_vm1, %v4787_v30  ;;  %v3159_v31 = vpop.permute.xlu1 %3158  ;;  %v3639_v33 = vpop.permute.xlu0 %3638 }
 0x42c   :  { %v3167_v34 = vsel %vm802_vm4, %v3157_v10, %v3159_v31  ;;  %3314 = vmatprep.mubr.f32.mxu1 %v4949_v4  ;;  %v3168_v38 = vsel %vm802_vm4, %v3159_v31, %v3161_v5  ;;  %v3652_v44 = vsel %vm1291_vm5, %v3639_v33, %v3641_v24 }
 0x42d   :  { %3250 = vmatprep.subr.mxu1 %v3167_v34 }
 0x42e   :  { %3251 = vmatpush1.msra.mxu1 %v3166_v32 }
 0x42f   :  { %4789 = vmatmul.mubr.msk.f32.vlgmr.msra.gmra.mrb[2].mxu1 %vm75_vm1, %v4787_v30  ;;  %v3163_v35 = vpop.permute.xlu1 %3162  ;;  %v3647_v36 = vpop.permute.xlu0 %3646 }
 0x430   :  { %v3169_v37 = vsel %vm802_vm4, %v3161_v5, %v3163_v35  ;;  %3385 = vmatprep.mubr.f32.mxu1 %v4949_v4 }
 0x431   :  { %3321 = vmatprep.subr.mxu1 %v3169_v37 }
 0x432   :  { %3322 = vmatpush1.msra.mxu1 %v3168_v38 }
 0x433   :  { %4790 = vmatmul.mubr.msk.f32.vlgmr.msra.gmra.mrb[4].mxu1 %vm75_vm1, %v4787_v30  ;;  %3403 = vmatprep.subr.mxu1 %v5332_v23  ;;  %v3901_v39 = vpop.permute.xlu1 %3900  ;;  %v3893_v40 = vpop.permute.xlu0 %3892 }
 0x434   :  { %3404 = vmatpush1.msra.mxu1 %v5322_v16  ;;  %3467 = vmatprep.mubr.f32.mxu1 %v4949_v4 }
 0x435   :  { %3474 = vmatprep.subr.mxu1 %v5346_v28 }
 0x437   :  { %4792 = vmatmul.mubr.msk.f32.vlgmr.msra.gmra.mrb[0].mxu1 %vm75_vm1, %v4791_v41  ;;  %v3643_v42 = vpop.permute.xlu1 %3642  ;;  %v3895_v43 = vpop.permute.xlu0 %3894 }
 0x438   :  { %3475 = vmatpush1.msra.mxu1 %v5339_v26  ;;  %3538 = vmatprep.mubr.f32.mxu1 %v4949_v4  ;;  %v3653_v23 = vsel %vm1291_vm5, %v3641_v24, %v3643_v42  ;;  %v3904_v57 = vsel %vm1542_vm6, %v3893_v40, %v3895_v43 }
 0x439   :  { %3545 = vmatprep.subr.mxu1 %v5325_v20  ;;  %v4795_v20 = vld [vmem:[%s5636_s5 + $0x28] sm:$0xff] }
 0x43b   :  { %4793 = vmatmul.mubr.msk.f32.vlgmr.msra.gmra.mrb[2].mxu1 %vm75_vm1, %v4791_v41  ;;  %v3645_v16 = vpop.permute.xlu1 %3644  ;;  %v3899_v28 = vpop.permute.xlu0 %3898 }
 0x43c   :  { %3546 = vmatpush1.msra.mxu1 %v5349_v29  ;;  %3609 = vmatprep.mubr.f32.mxu1 %v4949_v4  ;;  %v3655_v45 = vsel %vm1291_vm5, %v3645_v16, %v3647_v36  ;;  %v3654_v29 = vsel %vm1291_vm5, %v3643_v42, %v3645_v16  ;;  %v3907_v60 = vsel %vm1542_vm6, %v3899_v28, %v3901_v39 }
 0x43d   :  { %3667 = vmatprep.subr.mxu1 %v3653_v23 }
 0x43f   :  { %4794 = vmatmul.mubr.msk.f32.vlgmr.msra.gmra.mrb[4].mxu1 %vm75_vm1, %v4791_v41  ;;  %v3649_v26 = vpop.permute.xlu1 %3648  ;;  %v4141_v46 = vpop.permute.xlu0 %4140 }
 0x440   :  { %3668 = vmatpush1.msra.mxu1 %v3652_v44  ;;  %3731 = vmatprep.mubr.f32.mxu1 %v4949_v4  ;;  %v3657_v48 = vsel %vm1291_vm5, %v3649_v26, %v5485_v15  ;;  %v3656_v49 = vsel %vm1291_vm5, %v3647_v36, %v3649_v26 }
 0x441   :  { %3738 = vmatprep.subr.mxu1 %v3655_v45 }
 0x443   :  { %4796 = vmatmul.mubr.msk.f32.vlgmr.msra.gmra.mrb[0].mxu1 %vm75_vm1, %v4795_v20  ;;  %v3891_v47 = vpop.permute.xlu1 %3890  ;;  %v4139_v52 = vpop.permute.xlu0 %4138 }
 0x444   :  { %3739 = vmatpush1.msra.mxu1 %v3654_v29  ;;  %3802 = vmatprep.mubr.f32.mxu1 %v4949_v4  ;;  %v3903_v51 = vsel %vm1542_vm6, %v3891_v47, %v3893_v40  ;;  %v4152_v10 = vsel %vm1793_vm7, %v4139_v52, %v4141_v46 }
 0x445   :  { %3809 = vmatprep.subr.mxu1 %v3657_v48 }
 0x447   :  { %4797 = vmatmul.mubr.msk.f32.vlgmr.msra.gmra.mrb[2].mxu1 %vm75_vm1, %v4795_v20  ;;  %v3889_v50 = vpop.permute.xlu1 %3888  ;;  %v4147_v58 = vpop.permute.xlu0 %4146 }
 0x448   :  { %3810 = vmatpush1.msra.mxu1 %v3656_v49  ;;  %3873 = vmatprep.mubr.f32.mxu1 %v4949_v4  ;;  %v3902_v53 = vsel %vm1542_vm6, %v3889_v50, %v3891_v47 }
 0x449   :  { %3917 = vmatprep.subr.mxu1 %v3903_v51 }
 0x44b   :  { %4798 = vmatmul.mubr.msk.f32.vlgmr.msra.gmra.mrb[4].mxu1 %vm75_vm1, %v4795_v20  ;;  %v3897_v54 = vpop.permute.xlu1 %3896  ;;  %v4151_v8 = vpop.permute.xlu0 %4150 }
 0x44c   :  { %3918 = vmatpush1.msra.mxu1 %v3902_v53  ;;  %v3905_v55 = vsel %vm1542_vm6, %v3895_v43, %v3897_v54  ;;  %3981 = vmatprep.mubr.f32.mxu1 %v4949_v4  ;;  %v3906_v61 = vsel %vm1542_vm6, %v3897_v54, %v3899_v28 }
 0x44d   :  { %3988 = vmatprep.subr.mxu1 %v3905_v55 }
 0x44f   :  { %4800 = vmatmul.mubr.msk.f32.vlgmr.msra.gmra.mrb[0].mxu1 %vm75_vm1, %v4799_v56  ;;  %v4143_v59 = vpop.permute.xlu1 %4142  ;;  %v4393_v13 = vpop.permute.xlu0 %4392 }
 0x450   :  { %3989 = vmatpush1.msra.mxu1 %v3904_v57  ;;  %4052 = vmatprep.mubr.f32.mxu1 %v4949_v4  ;;  %v4153_v63 = vsel %vm1793_vm7, %v4141_v46, %v4143_v59 }
 0x451   :  { %4059 = vmatprep.subr.mxu1 %v3907_v60 }
 0x453   :  { %4801 = vmatmul.mubr.msk.f32.vlgmr.msra.gmra.mrb[2].mxu1 %vm75_vm1, %v4799_v56  ;;  %v4145_v62 = vpop.permute.xlu1 %4144  ;;  %v4395_v21 = vpop.permute.xlu0 %4394 }
 0x454   :  { %4060 = vmatpush1.msra.mxu1 %v3906_v61  ;;  %4123 = vmatprep.mubr.f32.mxu1 %v4949_v4  ;;  %v4155_v12 = vsel %vm1793_vm7, %v4145_v62, %v4147_v58  ;;  %v4154_v5 = vsel %vm1793_vm7, %v4143_v59, %v4145_v62  ;;  %v4404_v30 = vsel %vm2044_vm8, %v4393_v13, %v4395_v21 }
 0x455   :  { %4167 = vmatprep.subr.mxu1 %v4153_v63 }
 0x457   :  { %4802 = vmatmul.mubr.msk.f32.vlgmr.msra.gmra.mrb[4].mxu1 %vm75_vm1, %v4799_v56  ;;  %v4149_v11 = vpop.permute.xlu1 %4148  ;;  %v4399_v31 = vpop.permute.xlu0 %4398 }
 0x458   :  { %4168 = vmatpush1.msra.mxu1 %v4152_v10  ;;  %4231 = vmatprep.mubr.f32.mxu1 %v4949_v4  ;;  %v4157_v7 = vsel %vm1793_vm7, %v4149_v11, %v4151_v8  ;;  %v4156_v6 = vsel %vm1793_vm7, %v4147_v58, %v4149_v11 }
 0x459   :  { %4238 = vmatprep.subr.mxu1 %v4155_v12 }
 0x45b   :  { %4804 = vmatmul.mubr.msk.f32.vlgmr.msra.gmra.mrb[0].mxu1 %vm75_vm1, %v4803_v0  ;;  %v4391_v3 = vpop.permute.xlu1 %4390 }
 0x45c   :  { %4239 = vmatpush1.msra.mxu1 %v4154_v5  ;;  %4302 = vmatprep.mubr.f32.mxu1 %v4949_v4  ;;  %v4403_v18 = vsel %vm2044_vm8, %v4391_v3, %v4393_v13 }
 0x45d   :  { %4309 = vmatprep.subr.mxu1 %v4157_v7  ;;  %v4703_v7 = vld [vmem:[%s5631_s0 + $0x8] sm:$0xff] }
 0x45f   :  { %4805 = vmatmul.mubr.msk.f32.vlgmr.msra.gmra.mrb[2].mxu1 %vm75_vm1, %v4803_v0  ;;  %v4389_v15 = vpop.permute.xlu1 %4388 }
 0x460   :  { %4310 = vmatpush1.msra.mxu1 %v4156_v6  ;;  %4373 = vmatprep.mubr.f32.mxu1 %v4949_v4  ;;  %v4402_v22 = vsel %vm2044_vm8, %v4389_v15, %v4391_v3 }
 0x461   :  { %4417 = vmatprep.subr.mxu1 %v4403_v18 }
 0x463   :  { %4806 = vmatmul.mubr.msk.f32.vlgmr.msra.gmra.mrb[4].mxu1 %vm75_vm1, %v4803_v0  ;;  %v4397_v24 = vpop.permute.xlu1 %4396 }
 0x464   :  { %4418 = vmatpush1.msra.mxu1 %v4402_v22  ;;  %v4405_v25 = vsel %vm2044_vm8, %v4395_v21, %v4397_v24  ;;  %4481 = vmatprep.mubr.f32.mxu1 %v4949_v4  ;;  %v4406_v32 = vsel %vm2044_vm8, %v4397_v24, %v4399_v31  ;;  %v4704_v24 = vld [vmem:[%s5631_s0 + $0x10] sm:$0xff] }
 0x465   :  { %4488 = vmatprep.subr.mxu1 %v4405_v25  ;;  %v4705_v25 = vld [vmem:[%s5631_s0 + $0x18] sm:$0xff] }
 0x467   :  { %4808 = vmatmul.mubr.msk.f32.vlgmr.msra.gmra.mrb[0].mxu1 %vm75_vm1, %v4807_v27  ;;  %v4401_v33 = vpop.permute.xlu1 %4400 }
 0x468   :  { %4489 = vmatpush1.msra.mxu1 %v4404_v30  ;;  %v4407_v34 = vsel %vm2044_vm8, %v4399_v31, %v4401_v33  ;;  %4552 = vmatprep.mubr.f32.mxu1 %v4949_v4  ;;  %v4707_v33 = vld [vmem:[%s5631_s0 + $0x28] sm:$0xff] }
 0x469   :  { %4559 = vmatprep.subr.mxu1 %v4407_v34  ;;  %v4708_v34 = vld [vmem:[%s5631_s0 + $0x30] sm:$0xff] }
 0x46b   :  { %4809 = vmatmul.mubr.msk.f32.vlgmr.msra.gmra.mrb[2].mxu1 %vm75_vm1, %v4807_v27 }
 0x46c   :  { %4560 = vmatpush1.msra.mxu1 %v4406_v32  ;;  %4623 = vmatprep.mubr.f32.mxu1 %v4949_v4 }
 0x46f   :  { %4810 = vmatmul.mubr.msk.f32.vlgmr.msra.gmra.mrb[4].mxu1 %vm75_vm1, %v4807_v27  ;;  %v4706_v27 = vld [vmem:[%s5631_s0 + $0x20] sm:$0xff]  ;;  %s4924_s0 = scalar_lea.vmem %s4734_s23, 768 }
 0x470   :  { %p4925_p0 = scmp.ne.s32.totalorder %s4734_s23, %s4924_s0  ;;  %p4930_p2 = scmp.lt.s32.totalorder %s4924_s0, %s4924_s0 }
 0x472   :  { %p4931_p3 = por %p4930_p2, %p4929_p1 }
 0x474   :  { %p4932_p4 = pnand %p4931_p3, %p4925_p0 }
 0x53a   :  { %v4483_v35 = vpop.f32.mrb[0].mxu1 }
 0x53b   :  { %v4636_v36 = vmul.f32 %v4483_v35, %v5283_v1  ;;  %v4485_v37 = vpop.f32.mrb[1].mxu1 }
 0x53c   :  { %v4637_v38 = vmul.f32 %v4485_v37, %v5285_v9 }
 0x53e   :  { %v4642_v39 = vadd.f32 %v4637_v38, %v4636_v36  ;;  %v4554_v40 = vpop.f32.mrb[2].mxu1 }
 0x53f   :  { %v4638_v41 = vmul.f32 %v4554_v40, %v5288_v2  ;;  %v4556_v42 = vpop.f32.mrb[3].mxu1 }
 0x540   :  { %v4639_v43 = vmul.f32 %v4556_v42, %v5291_v14 }
 0x541   :  { %v4643_v16 = vadd.f32 %v4642_v39, %v4638_v41 }
 0x542   :  { %v4625_v23 = vpop.f32.mrb[4].mxu1 }
 0x543   :  { %v4644_v28 = vadd.f32 %v4643_v16, %v4639_v43  ;;  %v4640_v4 = vmul.f32 %v4625_v23, %v5294_v17  ;;  %v4627_v44 = vpop.f32.mrb[5].mxu1 }
 0x544   :  { %v4641_v26 = vmul.f32 %v4627_v44, %v5297_v19 }
 0x545   :  { %v4645_v45 = vadd.f32 %v4644_v28, %v4640_v4 }
 0x547   :  { %v4646_v20 = vadd.f32 %v4645_v45, %v4641_v26 }
 0x549   :  { %4647 = vadd.xlane.f32.xlu0 %v4646_v20 }
 0x5d6   :  { %v4648_v29 = vpop.xlane.xlu0 %4647 }
 0x5d7   :  { %v4649_v46 = vmul.f32 0.001953125, %v4648_v29 }
 0x5d9   :  { %v4650_v47 = vsub.f32 %v4483_v35, %v4649_v46  ;;  %v4651_v48 = vsub.f32 %v4485_v37, %v4649_v46  ;;  %v4652_v49 = vsub.f32 %v4554_v40, %v4649_v46  ;;  %v4653_v50 = vsub.f32 %v4556_v42, %v4649_v46 }
 0x5da   :  { %v4654_v51 = vsub.f32 %v4625_v23, %v4649_v46  ;;  %v4655_v55 = vsub.f32 %v4627_v44, %v4649_v46 }
 0x5db   :  { %v4656_v52 = vmul.f32 %v4650_v47, %v5283_v1  ;;  %v4657_v53 = vmul.f32 %v4651_v48, %v5285_v9  ;;  %v4658_v54 = vmul.f32 %v4652_v49, %v5288_v2  ;;  %v4659_v56 = vmul.f32 %v4653_v50, %v5291_v14  ;;  %v4691_v2 = vld [vmem:[%s5638_s7] sm:$0xff] }
 0x5dc   :  { %v4660_v59 = vmul.f32 %v4654_v51, %v5294_v17  ;;  %v4661_v62 = vmul.f32 %v4655_v55, %v5297_v19  ;;  %v4676_v19 = vld [vmem:[%s5637_s6] sm:$0xff] }
 0x5dd   :  { %v4662_v57 = vmul.f32 %v4656_v52, %v4656_v52  ;;  %v4663_v58 = vmul.f32 %v4657_v53, %v4657_v53  ;;  %v4664_v60 = vmul.f32 %v4658_v54, %v4658_v54  ;;  %v4665_v63 = vmul.f32 %v4659_v56, %v4659_v56 }
 0x5de   :  { %v4666_v10 = vmul.f32 %v4660_v59, %v4660_v59  ;;  %v4667_v1 = vmul.f32 %v4661_v62, %v4661_v62 }
 0x5df   :  { %v4668_v61 = vadd.f32 %v4663_v58, %v4662_v57 }
 0x5e1   :  { %v4669_v8 = vadd.f32 %v4668_v61, %v4664_v60 }
 0x5e3   :  { %v4670_v11 = vadd.f32 %v4669_v8, %v4665_v63 }
 0x5e5   :  { %v4671_v12 = vadd.f32 %v4670_v11, %v4666_v10 }
 0x5e7   :  { %v4672_v9 = vadd.f32 %v4671_v12, %v4667_v1 }
 0x5e9   :  { %4673 = vadd.xlane.f32.xlu1 %v4672_v9 }
 0x5fa   :  { %4694 = vperm.xlu1 %4919, %v4691_v2  }
 0x676   :  { %v4674_v14 = vpop.xlane.xlu1 %4673 }
 0x677   :  { %v4675_v0 = vmul.f32 0.001953125, %v4674_v14 }
 0x679   :  { %v4677_v17 = vadd.f32 1e-05, %v4675_v0 }
 0x67a   :  { %v4695_v22 = vpop.permute.xlu1 %4694 }
 0x67b   :  { %4922 = vrsqrt.f32 %v4677_v17 }
 0x685   :  { %v4923_v13 = vpop.eup %4922 }
 0x686   :  { %v4679_v5 = vmul.f32 %v4923_v13, %v4676_v19 }
 0x688   :  { %4682 = vperm.xlu0 %4918, %v4679_v5  }
 0x707   :  { %v4683_v3 = vpop.permute.xlu0 %4682 }
 0x708   :  { %v4685_v6 = vmul.f32 %v4683_v3, %v4650_v47  ;;  %v4686_v15 = vmul.f32 %v4683_v3, %v4651_v48  ;;  %v4687_v18 = vmul.f32 %v4683_v3, %v4652_v49  ;;  %v4688_v21 = vmul.f32 %v4683_v3, %v4653_v50 }
 0x709   :  { %v4689_v30 = vmul.f32 %v4683_v3, %v4654_v51  ;;  %v4690_v31 = vmul.f32 %v4683_v3, %v4655_v55 }
 0x70a   :  { %v4697_v32 = vadd.f32 %v4695_v22, %v4685_v6  ;;  %v4698_v35 = vadd.f32 %v4695_v22, %v4686_v15  ;;  %v4699_v36 = vadd.f32 %v4695_v22, %v4687_v18  ;;  %v4700_v37 = vadd.f32 %v4695_v22, %v4688_v21 }
 0x70b   :  { %v4701_v38 = vadd.f32 %v4695_v22, %v4689_v30  ;;  %v4702_v39 = vadd.f32 %v4695_v22, %v4690_v31 }
 0x70c   :  { %v4709_v40 = vadd.f32 %v4703_v7, %v4697_v32  ;;  %v4710_v41 = vadd.f32 %v4704_v24, %v4698_v35  ;;  %v4711_v42 = vadd.f32 %v4705_v25, %v4699_v36  ;;  %v4712_v43 = vadd.f32 %v4706_v27, %v4700_v37 }
 0x70d   :  { %v4713_v16 = vadd.f32 %v4707_v33, %v4701_v38  ;;  %v4714_v23 = vadd.f32 %v4708_v34, %v4702_v39 }
 0x70e   :  { %v4715_v28 = vmax.f32 %v4709_v40, 0.0  ;;  %v4716_v4 = vmax.f32 %v4710_v41, 0.0  ;;  %v4717_v44 = vmax.f32 %v4711_v42, 0.0  ;;  %v4718_v26 = vmax.f32 %v4712_v43, 0.0 }
 0x70f   :  { %v4719_v45 = vmax.f32 %v4713_v16, 0.0  ;;  %v4720_v20 = vmax.f32 %v4714_v23, 0.0 }
 0x710   :  { %4721 = vst [vmem:[#allocation3] sm:$0xff] %v4715_v28  ;;  %4722 = vst [vmem:[#allocation3 + $0x8] sm:$0xff] %v4716_v4 }
 0x711   :  { %4723 = vst [vmem:[#allocation3 + $0x10] sm:$0xff] %v4717_v44  ;;  %4724 = vst [vmem:[#allocation3 + $0x18] sm:$0xff] %v4718_v26 }
 0x712   :  { %4725 = vst [vmem:[#allocation3 + $0x20] sm:$0xff] %v4719_v45  ;;  %4726 = vst [vmem:[#allocation3 + $0x28] sm:$0xff] %v4720_v20 }
 0x713   :  { %4935 = shalt.err (!%p4932_p4)
}
 0x714   :  { %s4936_s28 = scalar_lea.hbm %s5639_s8, 768 }
 0x715   :  { %p4937_p5 = scmp.ne.s32.totalorder %s5639_s8, %s4936_s28  ;;  %p4940_p6 = scmp.lt.u32.totalorder %s4936_s28, %s5639_s8 }
 0x717   :  { %p4942_p7 = pnand %p4940_p6, %p4937_p5 }
 0x719   :  { %4945 = shalt.err (!%p4942_p7)
}
 0x71a   :  { %4736 = dma.vmem_to_hbm [thread:$0]  %s4734_s23, 768, %s5639_s8, [#allocation4]  }
 0x71b   :  { %4946 = dma.done.wait [#allocation4], 768  }
 0x71c   :  { %4947 = vsyncadd [#allocation4], 4294966528 }
 0x71d   :  { %4740 = vsyncpa [#allocation4], 1 }

</bundles_post_ra>
